<compile_context>
chip_gen: v5e
topology: v5e:2x2
jax: 0.10.0
libtpu: 0.0.40
codegen_flags: <defaults>
</compile_context>

<pallas_src>
import jax
import jax.numpy as jnp
from jax import lax
from jax.experimental import pallas as pl
from jax.experimental.pallas import tpu as pltpu


# -----------------------------------------------------------------------------
# Kernel
# -----------------------------------------------------------------------------
def _make_kernel(h_dim, n_hidden, mxu_dtype):
    """h_dim: per-tower hidden width. n_hidden: number of fused (3h,3h) layers."""

    def kernel(xin_ref, w1_ref, w_ref, b_ref, bias_ref, out_ref):
        f32 = jnp.float32

        # Layer 1: one block-diagonal matmul covers all three towers.
        # xin = [beta | phi | y] concatenated along lanes (done in the wrapper).
        x = jnp.dot(xin_ref[...], w1_ref[...], preferred_element_type=f32)
        x = jnp.maximum(x + b_ref[0:1, :], 0.0)                  # (tb, 3h) f32

        # Layers 2..5: block-diagonal (3h, 3h) weights, one MXU push each.
        for l in range(n_hidden):
            z = jnp.dot(x.astype(mxu_dtype), w_ref[l],
                        preferred_element_type=f32)
            x = jnp.maximum(z + b_ref[l + 1:l + 2, :], 0.0)      # (tb, 3h) f32

        beta = x[:, 0:h_dim]
        phi = x[:, h_dim:2 * h_dim]
        trunk = x[:, 2 * h_dim:3 * h_dim]
        prod = phi * beta * trunk                                # (tb, h) f32

        # Final reduction over h on the MXU, emitted lane-dense:
        #   row[0, i] = sum_j prod[i, j]      -> shape (1, tb)
        ones_row = jnp.ones((1, h_dim), f32)
        row = lax.dot_general(ones_row, prod,
                              dimension_numbers=(((1,), (1,)), ((), ())),
                              preferred_element_type=f32)        # (1, tb)
        out_ref[...] = (row + bias_ref[0]).astype(out_ref.dtype)

    return kernel


# -----------------------------------------------------------------------------
# Wrapper
# -----------------------------------------------------------------------------
def xideeponet_forward(beta_tr, phi_tr, y, packed, *, tb=None):
    """Fused XIDeepONet forward. `packed` comes from pack_params()."""
    B = beta_tr.shape[0]
    if tb is None:
        tb = 256 if (B % 256 == 0) else B     # big tile fills the MXU M dim
    assert B % tb == 0, "batch must be divisible by the batch tile"

    w1, w_rest, b_all, bias = packed["w1"], packed["w"], packed["b"], packed["bias"]
    mxu_dtype = w1.dtype
    k1, h3 = w1.shape
    h = h3 // 3
    n_hidden = w_rest.shape[0]
    n_layers = b_all.shape[0]

    # Concatenate the three tower inputs along the feature (lane) axis so the
    # fused block-diagonal layer-1 matmul sees a single operand; cast the MXU
    # inputs to the MXU dtype (bf16) here — VPU math inside stays f32.
    xin = jnp.concatenate([beta_tr, phi_tr, y], axis=-1).astype(mxu_dtype)
    assert xin.shape[1] == k1

    grid = (B // tb,)
    kernel = _make_kernel(h, n_hidden, mxu_dtype)

    out = pl.pallas_call(
        kernel,
        out_shape=jax.ShapeDtypeStruct((1, B), jnp.float32),     # lane-dense
        grid_spec=pltpu.PrefetchScalarGridSpec(
            num_scalar_prefetch=0,
            grid=grid,
            in_specs=[
                pl.BlockSpec((tb, k1), lambda i: (i, 0)),               # inputs
                pl.BlockSpec((k1, h3), lambda i: (0, 0)),               # w layer1
                pl.BlockSpec((n_hidden, h3, h3), lambda i: (0, 0, 0)),  # w layers 2..5
                pl.BlockSpec((n_layers, h3), lambda i: (0, 0)),         # biases
                pl.BlockSpec(memory_space=pltpu.MemorySpace.SMEM),      # scalar bias
            ],
            out_specs=pl.BlockSpec((1, tb), lambda i: (0, i)),
        ),
        compiler_params=pltpu.CompilerParams(
            dimension_semantics=("parallel",),   # batch tiles shard across cores
        ),
    )(xin, w1, w_rest, b_all, bias)

    return out.reshape(B, 1)


# -----------------------------------------------------------------------------
# Deterministic parameter construction (PyTorch nn.Linear-style uniform init)
# -----------------------------------------------------------------------------
def _linear_params(key, in_dim, out_dim):
    kw, kb = jax.random.split(key)
    bound = 1.0 / jnp.sqrt(jnp.float32(in_dim))
    # Stored as [in, out] (already "transposed" vs. PyTorch's weight).
    w = jax.random.uniform(kw, (in_dim, out_dim), jnp.float32, -bound, bound)
    b = jax.random.uniform(kb, (out_dim,), jnp.float32, -bound, bound)
    return w, b


def make_params(key, sensor_dim, in_dim, h_dim, n_layers=5):
    params = {"b_beta": [], "b_phi": [], "t": []}
    for tower_name, first_in in (("b_beta", sensor_dim),
                                 ("b_phi", sensor_dim),
                                 ("t", in_dim)):
        dims = [first_in] + [h_dim] * n_layers
        for l in range(n_layers):
            key, sub = jax.random.split(key)
            params[tower_name].append(_linear_params(sub, dims[l], dims[l + 1]))
    params["bias"] = jnp.zeros((1,), jnp.float32)   # self.p['bias'] = zeros([1])
    return params


def pack_params(params, mxu_dtype=jnp.bfloat16):
    """Pack the per-tower weights into block-diagonal fused MXU operands."""
    n_layers = len(params["b_beta"])

    def blockdiag(mats):
        rows = sum(m.shape[0] for m in mats)
        cols = sum(m.shape[1] for m in mats)
        out = jnp.zeros((rows, cols), jnp.float32)
        r = c = 0
        for m in mats:
            out = out.at[r:r + m.shape[0], c:c + m.shape[1]].set(m)
            r += m.shape[0]
            c += m.shape[1]
        return out

    w_stacked, b_stacked = [], []
    for l in range(n_layers):
        ws = [params[t][l][0] for t in ("b_beta", "b_phi", "t")]
        bs = [params[t][l][1] for t in ("b_beta", "b_phi", "t")]
        w_stacked.append(blockdiag(ws))
        b_stacked.append(jnp.concatenate([b.reshape(-1) for b in bs]))

    return {
        "w1": w_stacked[0].astype(mxu_dtype),              # (2*sensor + in, 3h)
        "w": jnp.stack(w_stacked[1:]).astype(mxu_dtype),   # (n_layers-1, 3h, 3h)
        "b": jnp.stack(b_stacked).astype(jnp.float32),     # (n_layers, 3h)
        "bias": params["bias"].astype(jnp.float32),        # (1,)
    }


# -----------------------------------------------------------------------------
# Pure-JAX reference (mirrors the PyTorch forward; mxu_dtype=bf16 simulates the
# kernel's bf16 MXU inputs with f32 accumulation).
# -----------------------------------------------------------------------------
def reference_forward(beta_tr, phi_tr, y, params, mxu_dtype=jnp.float32):
    def tower(x, wbs):
        for (w, b) in wbs:
            z = jnp.dot(x.astype(mxu_dtype), w.astype(mxu_dtype),
                        preferred_element_type=jnp.float32)
            x = jnp.maximum(z + b, 0.0)
        return x

    branch_beta = tower(beta_tr, params["b_beta"])
    branch_phi = tower(phi_tr, params["b_phi"])
    trunk = tower(y, params["t"])
    return (jnp.sum(branch_phi * branch_beta * trunk, axis=-1, keepdims=True)
            + params["bias"])


# -----------------------------------------------------------------------------
if __name__ == "__main__":
    B = 512           # batch of query/sensor samples (2 grid steps of tb=256)
    SENSOR_DIM = 16   # sensor_dim
    IN_DIM = 2        # in_dim (trunk coordinate dimension)
    H_DIM = 32        # h_dim

    key = jax.random.PRNGKey(0)
    k_beta, k_phi, k_y, k_params = jax.random.split(key, 4)

    beta_tr = jax.random.normal(k_beta, (B, SENSOR_DIM), jnp.float32)
    phi_tr = jax.random.normal(k_phi, (B, SENSOR_DIM), jnp.float32)
    y = jax.random.normal(k_y, (B, IN_DIM), jnp.float32)

    params = make_params(k_params, SENSOR_DIM, IN_DIM, H_DIM)
    packed = pack_params(params, mxu_dtype=jnp.bfloat16)

    out = xideeponet_forward(beta_tr, phi_tr, y, packed, tb=256)
    out = jax.block_until_ready(out)
    assert out.shape == (B, 1)

    # Tight check: reference run with the same bf16 MXU inputs / f32 accumulation.
    ref_mxu = reference_forward(beta_tr, phi_tr, y, params, mxu_dtype=jnp.bfloat16)
    assert jnp.allclose(out, ref_mxu, atol=2e-2, rtol=2e-2), "mismatch vs bf16 reference"

    # Loose check: full-f32 module semantics preserved within bf16 rounding.
    ref_f32 = reference_forward(beta_tr, phi_tr, y, params, mxu_dtype=jnp.float32)
    rel = float(jnp.max(jnp.abs(out - ref_f32)) /
                (jnp.max(jnp.abs(ref_f32)) + 1e-8))
    assert rel < 0.1, f"relative error vs f32 reference too large: {rel}"

    print("KERNEL_OK")
</pallas_src>

<mosaic_0001>
module attributes {stable_mosaic.version = 11 : i64} {
  func.func @kernel(%arg0: i32, %arg1: memref<256x34xbf16, #tpu.memory_space<vmem>>, %arg2: memref<34x96xbf16, #tpu.memory_space<vmem>>, %arg3: memref<4x96x96xbf16, #tpu.memory_space<vmem>>, %arg4: memref<5x96xf32, #tpu.memory_space<vmem>>, %arg5: memref<1xf32, #tpu.memory_space<smem>>, %arg6: memref<1x256xf32, #tpu.memory_space<vmem>>) attributes {dimension_semantics = [#tpu.dimension_semantics<parallel>], iteration_bounds = array<i64: 2>, scalar_prefetch = 0 : i64, scratch_operands = 0 : i64, tpu.core_type = #tpu.core_type<tc>, window_params = [{transform_indices = @transform_0, window_bounds = array<i64: 256, 34>}, {pipeline_mode = #tpu.pipeline_mode<synchronous>, transform_indices = @transform_1, window_bounds = array<i64: 34, 96>}, {pipeline_mode = #tpu.pipeline_mode<synchronous>, transform_indices = @transform_2, window_bounds = array<i64: 4, 96, 96>}, {pipeline_mode = #tpu.pipeline_mode<synchronous>, transform_indices = @transform_3, window_bounds = array<i64: 5, 96>}, {transform_indices = @transform_4, window_bounds = array<i64: 1>}, {transform_indices = @transform_5, window_bounds = array<i64: 1, 256>}]} {
    %c0 = arith.constant 0 : index
    %c0_0 = arith.constant 0 : index
    %0 = vector.load %arg1[%c0, %c0_0] : memref<256x34xbf16, #tpu.memory_space<vmem>>, vector<256x34xbf16>
    %c0_1 = arith.constant 0 : index
    %c0_2 = arith.constant 0 : index
    %1 = vector.load %arg2[%c0_1, %c0_2] : memref<34x96xbf16, #tpu.memory_space<vmem>>, vector<34x96xbf16>
    %cst = arith.constant dense<0.000000e+00> : vector<256x96xf32>
    %2 = tpu.matmul %0, %1, %cst {dimension_numbers = #tpu.dot_dimension_numbers<[1], [0], [0], [1], [0, 0, 1, 1], [], []>} : vector<256x34xbf16>, vector<34x96xbf16>, vector<256x96xf32> -> vector<256x96xf32>
    %c0_3 = arith.constant 0 : index
    %c0_4 = arith.constant 0 : index
    %3 = vector.load %arg4[%c0_3, %c0_4] : memref<5x96xf32, #tpu.memory_space<vmem>>, vector<1x96xf32>
    %4 = vector.broadcast %3 : vector<1x96xf32> to vector<256x96xf32>
    %5 = arith.addf %2, %4 : vector<256x96xf32>
    %cst_5 = arith.constant 0.000000e+00 : f32
    %6 = vector.broadcast %cst_5 : f32 to vector<256x96xf32>
    %7 = arith.maximumf %5, %6 : vector<256x96xf32>
    %8 = arith.truncf %7 : vector<256x96xf32> to vector<256x96xbf16>
    %c0_6 = arith.constant 0 : index
    %c0_7 = arith.constant 0 : index
    %c0_8 = arith.constant 0 : index
    %9 = vector.load %arg3[%c0_6, %c0_7, %c0_8] : memref<4x96x96xbf16, #tpu.memory_space<vmem>>, vector<1x96x96xbf16>
    %10 = vector.shape_cast %9 : vector<1x96x96xbf16> to vector<96x96xbf16>
    %cst_9 = arith.constant dense<0.000000e+00> : vector<256x96xf32>
    %11 = tpu.matmul %8, %10, %cst_9 {dimension_numbers = #tpu.dot_dimension_numbers<[1], [0], [0], [1], [0, 0, 1, 1], [], []>} : vector<256x96xbf16>, vector<96x96xbf16>, vector<256x96xf32> -> vector<256x96xf32>
    %c1 = arith.constant 1 : index
    %c0_10 = arith.constant 0 : index
    %12 = vector.load %arg4[%c1, %c0_10] : memref<5x96xf32, #tpu.memory_space<vmem>>, vector<1x96xf32>
    %13 = vector.broadcast %12 : vector<1x96xf32> to vector<256x96xf32>
    %14 = arith.addf %11, %13 : vector<256x96xf32>
    %cst_11 = arith.constant 0.000000e+00 : f32
    %15 = vector.broadcast %cst_11 : f32 to vector<256x96xf32>
    %16 = arith.maximumf %14, %15 : vector<256x96xf32>
    %17 = arith.truncf %16 : vector<256x96xf32> to vector<256x96xbf16>
    %c1_12 = arith.constant 1 : index
    %c0_13 = arith.constant 0 : index
    %c0_14 = arith.constant 0 : index
    %18 = vector.load %arg3[%c1_12, %c0_13, %c0_14] : memref<4x96x96xbf16, #tpu.memory_space<vmem>>, vector<1x96x96xbf16>
    %19 = vector.shape_cast %18 : vector<1x96x96xbf16> to vector<96x96xbf16>
    %cst_15 = arith.constant dense<0.000000e+00> : vector<256x96xf32>
    %20 = tpu.matmul %17, %19, %cst_15 {dimension_numbers = #tpu.dot_dimension_numbers<[1], [0], [0], [1], [0, 0, 1, 1], [], []>} : vector<256x96xbf16>, vector<96x96xbf16>, vector<256x96xf32> -> vector<256x96xf32>
    %c2 = arith.constant 2 : index
    %c0_16 = arith.constant 0 : index
    %21 = vector.load %arg4[%c2, %c0_16] : memref<5x96xf32, #tpu.memory_space<vmem>>, vector<1x96xf32>
    %22 = vector.broadcast %21 : vector<1x96xf32> to vector<256x96xf32>
    %23 = arith.addf %20, %22 : vector<256x96xf32>
    %cst_17 = arith.constant 0.000000e+00 : f32
    %24 = vector.broadcast %cst_17 : f32 to vector<256x96xf32>
    %25 = arith.maximumf %23, %24 : vector<256x96xf32>
    %26 = arith.truncf %25 : vector<256x96xf32> to vector<256x96xbf16>
    %c2_18 = arith.constant 2 : index
    %c0_19 = arith.constant 0 : index
    %c0_20 = arith.constant 0 : index
    %27 = vector.load %arg3[%c2_18, %c0_19, %c0_20] : memref<4x96x96xbf16, #tpu.memory_space<vmem>>, vector<1x96x96xbf16>
    %28 = vector.shape_cast %27 : vector<1x96x96xbf16> to vector<96x96xbf16>
    %cst_21 = arith.constant dense<0.000000e+00> : vector<256x96xf32>
    %29 = tpu.matmul %26, %28, %cst_21 {dimension_numbers = #tpu.dot_dimension_numbers<[1], [0], [0], [1], [0, 0, 1, 1], [], []>} : vector<256x96xbf16>, vector<96x96xbf16>, vector<256x96xf32> -> vector<256x96xf32>
    %c3 = arith.constant 3 : index
    %c0_22 = arith.constant 0 : index
    %30 = vector.load %arg4[%c3, %c0_22] : memref<5x96xf32, #tpu.memory_space<vmem>>, vector<1x96xf32>
    %31 = vector.broadcast %30 : vector<1x96xf32> to vector<256x96xf32>
    %32 = arith.addf %29, %31 : vector<256x96xf32>
    %cst_23 = arith.constant 0.000000e+00 : f32
    %33 = vector.broadcast %cst_23 : f32 to vector<256x96xf32>
    %34 = arith.maximumf %32, %33 : vector<256x96xf32>
    %35 = arith.truncf %34 : vector<256x96xf32> to vector<256x96xbf16>
    %c3_24 = arith.constant 3 : index
    %c0_25 = arith.constant 0 : index
    %c0_26 = arith.constant 0 : index
    %36 = vector.load %arg3[%c3_24, %c0_25, %c0_26] : memref<4x96x96xbf16, #tpu.memory_space<vmem>>, vector<1x96x96xbf16>
    %37 = vector.shape_cast %36 : vector<1x96x96xbf16> to vector<96x96xbf16>
    %cst_27 = arith.constant dense<0.000000e+00> : vector<256x96xf32>
    %38 = tpu.matmul %35, %37, %cst_27 {dimension_numbers = #tpu.dot_dimension_numbers<[1], [0], [0], [1], [0, 0, 1, 1], [], []>} : vector<256x96xbf16>, vector<96x96xbf16>, vector<256x96xf32> -> vector<256x96xf32>
    %c4 = arith.constant 4 : index
    %c0_28 = arith.constant 0 : index
    %39 = vector.load %arg4[%c4, %c0_28] : memref<5x96xf32, #tpu.memory_space<vmem>>, vector<1x96xf32>
    %40 = vector.broadcast %39 : vector<1x96xf32> to vector<256x96xf32>
    %41 = arith.addf %38, %40 : vector<256x96xf32>
    %cst_29 = arith.constant 0.000000e+00 : f32
    %42 = vector.broadcast %cst_29 : f32 to vector<256x96xf32>
    %43 = arith.maximumf %41, %42 : vector<256x96xf32>
    %44 = vector.extract_strided_slice %43 {offsets = [0, 0], sizes = [256, 32], strides = [1, 1]} : vector<256x96xf32> to vector<256x32xf32>
    %45 = vector.extract_strided_slice %43 {offsets = [0, 32], sizes = [256, 32], strides = [1, 1]} : vector<256x96xf32> to vector<256x32xf32>
    %46 = vector.extract_strided_slice %43 {offsets = [0, 64], sizes = [256, 32], strides = [1, 1]} : vector<256x96xf32> to vector<256x32xf32>
    %47 = arith.mulf %45, %44 : vector<256x32xf32>
    %48 = arith.mulf %47, %46 : vector<256x32xf32>
    %cst_30 = arith.constant 1.000000e+00 : f32
    %49 = vector.broadcast %cst_30 : f32 to vector<1x32xf32>
    %cst_31 = arith.constant dense<0.000000e+00> : vector<1x256xf32>
    %50 = tpu.matmul %49, %48, %cst_31 {dimension_numbers = #tpu.dot_dimension_numbers<[1], [1], [0], [0], [0, 0, 1, 0], [], []>} : vector<1x32xf32>, vector<256x32xf32>, vector<1x256xf32> -> vector<1x256xf32>
    %c0_32 = arith.constant 0 : index
    %51 = memref.load %arg5[%c0_32] : memref<1xf32, #tpu.memory_space<smem>>
    %52 = vector.broadcast %51 : f32 to vector<1x256xf32>
    %53 = arith.addf %50, %52 : vector<1x256xf32>
    %c0_33 = arith.constant 0 : index
    %c0_34 = arith.constant 0 : index
    %54 = vector.load %arg6[%c0_33, %c0_34] : memref<1x256xf32, #tpu.memory_space<vmem>>, vector<1x256xf32>
    tpu.vector_store %arg6[%c0_33, %c0_34], %53 {strides = array<i32>} : memref<1x256xf32, #tpu.memory_space<vmem>>, vector<1x256xf32>,
    return
  }
  func.func @transform_0(%arg0: i32) -> (i32, i32) {
    %c0_i32 = arith.constant 0 : i32
    %c0_i32_0 = arith.constant 0 : i32
    return %arg0, %c0_i32 : i32, i32
  }
  func.func @transform_1(%arg0: i32) -> (i32, i32) {
    %c0_i32 = arith.constant 0 : i32
    %c0_i32_0 = arith.constant 0 : i32
    %c0_i32_1 = arith.constant 0 : i32
    return %c0_i32, %c0_i32_0 : i32, i32
  }
  func.func @transform_2(%arg0: i32) -> (i32, i32, i32) {
    %c0_i32 = arith.constant 0 : i32
    %c0_i32_0 = arith.constant 0 : i32
    %c0_i32_1 = arith.constant 0 : i32
    %c0_i32_2 = arith.constant 0 : i32
    return %c0_i32, %c0_i32_0, %c0_i32_1 : i32, i32, i32
  }
  func.func @transform_3(%arg0: i32) -> (i32, i32) {
    %c0_i32 = arith.constant 0 : i32
    %c0_i32_0 = arith.constant 0 : i32
    %c0_i32_1 = arith.constant 0 : i32
    return %c0_i32, %c0_i32_0 : i32, i32
  }
  func.func @transform_4(%arg0: i32) -> i32 {
    %c0_i32 = arith.constant 0 : i32
    %c0_i32_0 = arith.constant 0 : i32
    return %c0_i32 : i32
  }
  func.func @transform_5(%arg0: i32) -> (i32, i32) {
    %c0_i32 = arith.constant 0 : i32
    %c0_i32_0 = arith.constant 0 : i32
    return %c0_i32, %arg0 : i32, i32
  }
}

</mosaic_0001>

<bundles_post_ra>
// kernel: tpu_custom_call.1
= control target key start
LH: loop header
LB: loop body
LE: loop exit
PB: predicated region body
PF: predicated region fallthrough
CT: control target
= control target key end

     0   :  { %s3383_s0 = inlined_call_operand.vmem [shape: bf16[512,34], index: 0, kind: input, shape index: {}]   ;;  %s3384_s1 = inlined_call_operand.vmem [shape: bf16[34,96], index: 1, kind: input, shape index: {}]   ;;  %s3385_s2 = inlined_call_operand.vmem [shape: bf16[4,96,96], index: 2, kind: input, shape index: {}]   ;;  %s3386_s3 = inlined_call_operand.vmem [shape: f32[5,96], index: 3, kind: input, shape index: {}]   ;;  %s3387_s4 = inlined_call_operand.<no memory space> [shape: f32[1], index: 4, kind: input, shape index: {}]   ;;  %s3388_s5 = inlined_call_operand.hbm [shape: f32[1,512], index: 5, kind: output, shape index: {}]  }
   0x1   :  { %10 = sst [smem:[#allocation2]] %s3387_s4 }
   0x2   :  { %11 = vsyncpa [#allocation4], 0 }
   0x3   :  { %13 = vsyncpa [#allocation4 + $0x1], 0  ;;  %s2586_s20 = smov 0   ;;  %s2588_s21 = smov 0  }
   0x4   :  { %s2590_s22 = smov 0   ;;  %s2592_s23 = smov 0  }
   0x5 LB: > { %s2607_s4 = sadd.s32 4294967295, %s2548_s23   ;;  %s2059_s24 = sadd.s32 4294967294, %s2548_s23   ;;  %s2548_s23 = sphi %s2592_s23, %s3394_s23   ;;  %s2544_s22 = sphi %s2590_s22, %s3393_s22   ;;  %s2540_s21 = sphi %s2588_s21, %s3392_s21   ;;  %s2536_s20 = sphi %s2586_s20, %s3391_s20  }
   0x6   : > { %s2611_s25 = sadd.s32 1, %s2548_s23   ;;  %s136_s26 = sadd.s32 1, %s2544_s22 }
   0x7   : > { %s133_s27 = ssub.s32 %s2548_s23, %s2611_s25  ;;  %p146_p0 = scmp.ne.s32.totalorder %s2544_s22, %s2540_s21 }
   0x8   : > { %p134_p1 = scmp.eq.s32.totalorder %s133_s27, 0  ;;  %p147_p2 = scmp.eq.s32.totalorder %s2607_s4, 1 }
   0x9   : > { %p152_p3 = scmp.ne.s32.totalorder %s2540_s21, %s2536_s20  ;;  %p153_p4 = scmp.eq.s32.totalorder %s2059_s24, 1 }
   0xa   : > { %s2622_s28 = scalar_select %p134_p1, %s2544_s22, %s136_s26  }
   0xb   : > { %p2624_p5 = por %p147_p2, %p146_p0  ;;  %p2628_p6 = por %p153_p4, %p152_p3 }
   0xc   : > { %p2062_p7 = scmp.ge.s32.totalorder %s2548_s23, 1  ;;  %p192_p8 = scmp.lt.s32.totalorder %s2548_s23, 3 }
   0xe   : > { %p193_p9 = pnand %p2062_p7, %p192_p8 }
   0xf   : > { %s2064_s8 = sshll.u32 (!%p193_p9), %s2607_s4, 5  ;;  %s2550_s7 = smov (!%p193_p9), 32  }
  0x10   : > { %196 = sbr.rel (%p193_p9) target bundleno = 1493 (0x5d5), region = 40  ;;  %p221_p10 = scmp.lt.s32.totalorder (!%p193_p9), %s2064_s8, 63 }
  0x11   : > { %s1768_s9 = sld [smem:[#allocation2]] (!%p193_p9)  ;;  %s217_s10 = sand.u32 (!%p193_p9), 1, %s2540_s21  }
  0x12   : > { %s2385_s12 = sshll.u32 (!%p193_p9), %s2607_s4, 1  ;;  %s1985_s4 = scalar_lea.sflag (!%p193_p9), [#allocation4], %s217_s10 }
  0x13   : > { %s1995_s15 = scalar_lea.hbm (!%p193_p9), %s3388_s5, %s2385_s12  ;;  %s2506_s6 = scalar_lea.hbm (!%p193_p9), %s3388_s5, 4 }
  0x14   : > { %s1999_s18 = sshll.u32 (!%p193_p9), %s1995_s15, 4  ;;  %s2000_s18 = int_to_ptr.hbm [resolvable:$true] %s1999_s18 }
  0x15   : > { %v264_v0 = vld [vmem:[%s3384_s1 + $0x10] sm:$0x1]  ;;  %vm411_vm0 = vcmask 1040384   ;;  %s3396_s8 = smov (!%p221_p10, %s2064_s8), 63  ;;  %v2405_v4 = vld [vmem:[%s3384_s1 + $0x8] sm:$0xff]  ;;  %v2404_v5 = vld [vmem:[%s3384_s1] sm:$0xff] }
  0x16   : > { %v356_v1 = vunpack.c.l.b16 %v264_v0  ;;  %s2065_s11 = sshll.u32 %s3396_s8, 2  ;;  %vm362_vm1 = vcmask 277504   ;;  %v2411_v11 = vld [vmem:[%s3385_s2 + $0x28] sm:$0xff]  ;;  %v2410_v12 = vld [vmem:[%s3385_s2 + $0x20] sm:$0xff]  ;;  %v2409_v17 = vld [vmem:[%s3385_s2 + $0x18] sm:$0xff]  ;;  %vm602_vm2 = vcmask 785408  }
  0x17   : > { %s2648_s16 = scalar_lea.vmem %s3383_s0, %s2065_s11  ;;  %v2408_v18 = vld [vmem:[%s3385_s2 + $0x10] sm:$0xff]  ;;  %v2407_v20 = vld [vmem:[%s3385_s2 + $0x8] sm:$0xff]  ;;  %v2406_v21 = vld [vmem:[%s3385_s2] sm:$0xff]  ;;  %s2551_s8 = smov 96   ;;  %vm1866_vm3 = vcmask 261120  }
  0x18   : > { %v359_v2 = vpack.c.b16 %v356_v1, %v356_v1  ;;  %v2388_v6 = vld [vmem:[%s2648_s16] sm:$0xff]  ;;  %v2389_v7 = vld [vmem:[%s2648_s16 + $0x8] sm:$0xff]  ;;  %v2390_v8 = vld [vmem:[%s2648_s16 + $0x10] sm:$0xff]  ;;  %s2063_s11 = sshll.u32 %s217_s10, 1  ;;  %s2500_s19 = sshra.s32 %s2000_s18, 4  ;;  %s2501_s19 = int_to_ptr.hbm [resolvable:$true] %s2500_s19 }
  0x19   : > { %v2393_v9 = vld [vmem:[%s2648_s16 + $0x28] sm:$0xff]  ;;  %v2395_v10 = vld [vmem:[%s2648_s16 + $0x38] sm:$0xff]  ;;  %v2394_v14 = vld [vmem:[%s2648_s16 + $0x30] sm:$0xff]  ;;  %s2502_s24 = scalar_lea.hbm %s2501_s19, 2  ;;  %p2507_p0 = scmp.lt.s32.totalorder %s2501_s19, %s3388_s5 }
  0x1a   : > { %v413_v3 = vsel %vm411_vm0, %v359_v2, 0  ;;  %v2391_v13 = vld [vmem:[%s2648_s16 + $0x18] sm:$0xff]  ;;  %v2396_v15 = vld [vmem:[%s2648_s16 + $0x40] sm:$0xff]  ;;  %v2397_v19 = vld [vmem:[%s2648_s16 + $0x48] sm:$0xff]  ;;  %p2503_p11 = scmp.ne.s32.totalorder %s2501_s19, %s2502_s24  ;;  %p2508_p1 = scmp.lt.s32.totalorder %s2506_s6, %s2502_s24 }
  0x1b   : > { %420 = vmatpush.bf16.msra.mxu0 %v413_v3  ;;  %2430 = vmatpush.bf16.msra.mxu1 %v413_v3  ;;  %v2392_v16 = vld [vmem:[%s2648_s16 + $0x20] sm:$0xff]  ;;  %v2398_v22 = vld [vmem:[%s2648_s16 + $0x50] sm:$0xff]  ;;  %v2399_v25 = vld [vmem:[%s2648_s16 + $0x58] sm:$0xff] }
  0x1c   : > { %2431 = vmatpush.bf16.msra.mxu2 %v413_v3  ;;  %2432 = vmatpush.bf16.msra.mxu3 %v413_v3  ;;  %v2693_v24 = vld [vmem:[%s3386_s3] ss:$0 sm:$0xff]  ;;  %v2401_v41 = vld [vmem:[%s2648_s16 + $0x68] sm:$0xff]  ;;  %v2402_v49 = vld [vmem:[%s2648_s16 + $0x70] sm:$0xff]  ;;  %p2504_p12 = pnand %p2503_p11, %p2624_p5  ;;  %p2509_p2 = por %p2508_p1, %p2507_p0 }
  0x1d   : > { %v2400_v33 = vld [vmem:[%s2648_s16 + $0x60] sm:$0xff]  ;;  %v2403_v57 = vld [vmem:[%s2648_s16 + $0x78] sm:$0xff]  ;;  %s219_s16 = scalar_lea.vmem [#allocation3], %s2063_s11 }
  0x1e   : > { %s1997_s17 = sshll.u32 %s219_s16, 4  ;;  %p2505_p13 = pneg %p2504_p12  ;;  %s1998_s17 = int_to_ptr.vmem [resolvable:$true] %s1997_s17 }
  0x1f   : > { %421 = vmatpush.bf16.msra.mxu0 %v2405_v4  ;;  %2433 = vmatpush.bf16.msra.mxu1 %v2405_v4 }
  0x20   : > { %2434 = vmatpush.bf16.msra.mxu2 %v2405_v4  ;;  %2435 = vmatpush.bf16.msra.mxu3 %v2405_v4  ;;  %p2510_p3 = pnand %p2509_p2, %p2505_p13 }
  0x23   : > { %422 = vmatpush.bf16.msra.mxu0 %v2404_v5  ;;  %2436 = vmatpush.bf16.msra.mxu1 %v2404_v5 }
  0x24   : > { %2437 = vmatpush.bf16.msra.mxu2 %v2404_v5  ;;  %2438 = vmatpush.bf16.msra.mxu3 %v2404_v5 }
  0x26   : > { %2138 = vmatmul.msk.bf16.vlgmr.msra.gmra.mxu0 %vm362_vm1, %v2388_v6  ;;  %2143 = vmatmul.msk.bf16.vlgmr.msra.gmra.mxu1 %vm362_vm1, %v2393_v9  ;;  %v2417_v9 = vld [vmem:[%s3385_s2 + $0x58] sm:$0xff] }
  0x27   : > { %2145 = vmatmul.msk.bf16.vlgmr.msra.gmra.mxu2 %vm362_vm1, %v2395_v10  ;;  %653 = vmatpush.bf16.msrb.mxu1 %v2411_v11  ;;  %v2416_v10 = vld [vmem:[%s3385_s2 + $0x50] sm:$0xff] }
  0x28   : > { %2149 = vmatmul.msk.bf16.vlgmr.msra.gmra.mxu3 %vm362_vm1, %v2399_v25  ;;  %889 = vmatpush.bf16.msrb.mxu2 %v2417_v9  ;;  %v2412_v25 = vld [vmem:[%s3385_s2 + $0x30] sm:$0xff] }
  0x2b   : > { %654 = vmatpush.bf16.msrb.mxu1 %v2410_v12 }
  0x2c   : > { %890 = vmatpush.bf16.msrb.mxu2 %v2416_v10 }
  0x2f   : > { %655 = vmatpush.bf16.msrb.mxu1 %v2409_v17  ;;  %v2415_v17 = vld [vmem:[%s3385_s2 + $0x48] sm:$0xff] }
  0x30   : > { %891 = vmatpush.bf16.msrb.mxu2 %v2415_v17 }
  0x33   : > { %656 = vmatpush.bf16.msrb.mxu1 %v2408_v18 }
  0x36   : > { %2139 = vmatmul.msk.bf16.gmra.mxu0 %vm362_vm1, %v2389_v7  ;;  %2144 = vmatmul.msk.bf16.gmra.mxu1 %vm362_vm1, %v2394_v14 }
  0x37   : > { %2146 = vmatmul.msk.bf16.gmra.mxu2 %vm362_vm1, %v2396_v15  ;;  %657 = vmatpush.bf16.msrb.mxu1 %v2407_v20 }
  0x38   : > { %2150 = vmatmul.msk.bf16.gmra.mxu3 %vm362_vm1, %v2400_v33 }
  0x3b   : > { %658 = vmatpush.bf16.msrb.mxu1 %v2406_v21  ;;  %v2413_v21 = vld [vmem:[%s3385_s2 + $0x38] sm:$0xff] }
  0x46   : > { %2140 = vmatmul.msk.bf16.gmra.mxu0 %vm362_vm1, %v2390_v8 }
  0x47   : > { %2147 = vmatmul.msk.bf16.gmra.mxu2 %vm362_vm1, %v2397_v19  ;;  %v2414_v19 = vld [vmem:[%s3385_s2 + $0x40] sm:$0xff] }
  0x48   : > { %2151 = vmatmul.msk.bf16.gmra.mxu3 %vm362_vm1, %v2401_v41  ;;  %892 = vmatpush.bf16.msrb.mxu2 %v2414_v19 }
  0x4c   : > { %893 = vmatpush.bf16.msrb.mxu2 %v2413_v21 }
  0x50   : > { %894 = vmatpush.bf16.msrb.mxu2 %v2412_v25 }
  0x56   : > { %2141 = vmatmul.msk.bf16.gmra.mxu0 %vm362_vm1, %v2391_v13 }
  0x57   : > { %2148 = vmatmul.msk.bf16.gmra.mxu2 %vm362_vm1, %v2398_v22 }
  0x58   : > { %2152 = vmatmul.msk.bf16.gmra.mxu3 %vm362_vm1, %v2402_v49 }
  0x66   : > { %2142 = vmatmul.msk.bf16.gmra.mxu0 %vm362_vm1, %v2392_v16 }
  0x68   : > { %2153 = vmatmul.msk.bf16.gmra.mxu3 %vm362_vm1, %v2403_v57 }
  0xa3   : > { %v424_v23 = vpop.f32.mrf.mxu0  ;;  %v449_v58 = vpop.f32.mrf.mxu1 }
  0xa4   : > { %v425_v26 = vadd.f32 %v2693_v24, %v424_v23  ;;  %v450_v2 = vadd.f32 %v2693_v24, %v449_v58 }
  0xa6   : > { %v504_v29 = vmax.f32 %v425_v26, 0.0  ;;  %v514_v5 = vmax.f32 %v450_v2, 0.0 }
  0xaa   : > { %v459_v7 = vpop.f32.mrf.mxu2 }
  0xab   : > { %v426_v27 = vpop.f32.mrf.mxu0  ;;  %v451_v1 = vpop.f32.mrf.mxu1  ;;  %v460_v22 = vadd.f32 %v2693_v24, %v459_v7 }
  0xac   : > { %v427_v28 = vadd.f32 %v2693_v24, %v426_v27  ;;  %v452_v3 = vadd.f32 %v2693_v24, %v451_v1 }
  0xad   : > { %v518_v26 = vmax.f32 %v460_v22, 0.0 }
  0xae   : > { %v505_v30 = vmax.f32 %v427_v28, 0.0  ;;  %v515_v6 = vmax.f32 %v452_v3, 0.0 }
  0xb0   : > { %v536_v31 = vpack.c.bf16 %v505_v30, %v504_v29  ;;  %v541_v8 = vpack.c.bf16 %v515_v6, %v514_v5 }
  0xb2   : > { %2178 = vmatmul.msk.bf16.vlgmr.msrb.gmra.mxu1 %vm602_vm2, %v536_v31  ;;  %v461_v14 = vpop.f32.mrf.mxu2 }
  0xb3   : > { %v429_v32 = vpop.f32.mrf.mxu0  ;;  %v454_v4 = vpop.f32.mrf.mxu1  ;;  %v462_v23 = vadd.f32 %v2693_v24, %v461_v14 }
  0xb4   : > { %v430_v34 = vadd.f32 %v2693_v24, %v429_v32  ;;  %v455_v12 = vadd.f32 %v2693_v24, %v454_v4 }
  0xb5   : > { %v519_v27 = vmax.f32 %v462_v23, 0.0 }
  0xb6   : > { %v506_v37 = vmax.f32 %v430_v34, 0.0  ;;  %v516_v15 = vmax.f32 %v455_v12, 0.0 }
  0xb7   : > { %v543_v29 = vpack.c.bf16 %v519_v27, %v518_v26 }
  0xba   : > { %v464_v20 = vpop.f32.mrf.mxu2 }
  0xbb   : > { %v431_v35 = vpop.f32.mrf.mxu0  ;;  %v456_v11 = vpop.f32.mrf.mxu1  ;;  %v465_v31 = vadd.f32 %v2693_v24, %v464_v20 }
  0xbc   : > { %v432_v36 = vadd.f32 %v2693_v24, %v431_v35  ;;  %v457_v13 = vadd.f32 %v2693_v24, %v456_v11 }
  0xbd   : > { %v520_v33 = vmax.f32 %v465_v31, 0.0 }
  0xbe   : > { %v507_v38 = vmax.f32 %v432_v36, 0.0  ;;  %v517_v16 = vmax.f32 %v457_v13, 0.0 }
  0xc0   : > { %v537_v39 = vpack.c.bf16 %v507_v38, %v506_v37  ;;  %v542_v18 = vpack.c.bf16 %v517_v16, %v516_v15  ;;  %v2752_v38 = vld [vmem:[%s3386_s3 + $0x1] ss:$0 sm:$0xff] }
  0xc2   : > { %2179 = vmatmul.msk.bf16.gmra.mxu1 %vm602_vm2, %v537_v39  ;;  %v466_v28 = vpop.f32.mrf.mxu2 }
  0xc3   : > { %v434_v40 = vpop.f32.mrf.mxu0  ;;  %v467_v32 = vadd.f32 %v2693_v24, %v466_v28 }
  0xc4   : > { %v435_v42 = vadd.f32 %v2693_v24, %v434_v40 }
  0xc5   : > { %v521_v34 = vmax.f32 %v467_v32, 0.0 }
  0xc6   : > { %v508_v45 = vmax.f32 %v435_v42, 0.0 }
  0xc7   : > { %v544_v36 = vpack.c.bf16 %v521_v34, %v520_v33 }
  0xca   : > { %v469_v30 = vpop.f32.mrf.mxu2 }
  0xcb   : > { %v436_v43 = vpop.f32.mrf.mxu0  ;;  %v470_v41 = vadd.f32 %v2693_v24, %v469_v30 }
  0xcc   : > { %v437_v44 = vadd.f32 %v2693_v24, %v436_v43 }
  0xce   : > { %v509_v46 = vmax.f32 %v437_v44, 0.0 }
  0xd0   : > { %v538_v47 = vpack.c.bf16 %v509_v46, %v508_v45 }
  0xd2   : > { %2180 = vmatmul.msk.bf16.gmra.mxu1 %vm602_vm2, %v538_v47  ;;  %v471_v37 = vpop.f32.mrf.mxu2  ;;  %v479_v47 = vpop.f32.mrf.mxu3 }
  0xd3   : > { %v439_v48 = vpop.f32.mrf.mxu0  ;;  %v472_v42 = vadd.f32 %v2693_v24, %v471_v37  ;;  %v480_v6 = vadd.f32 %v2693_v24, %v479_v47 }
  0xd4   : > { %v440_v50 = vadd.f32 %v2693_v24, %v439_v48  ;;  %v522_v48 = vmax.f32 %v470_v41, 0.0 }
  0xd5   : > { %v523_v49 = vmax.f32 %v472_v42, 0.0  ;;  %v526_v12 = vmax.f32 %v480_v6, 0.0 }
  0xd6   : > { %v510_v53 = vmax.f32 %v440_v50, 0.0 }
  0xda   : > { %v474_v46 = vpop.f32.mrf.mxu2 }
  0xdb   : > { %v441_v51 = vpop.f32.mrf.mxu0  ;;  %v475_v57 = vadd.f32 %v2693_v24, %v474_v46 }
  0xdc   : > { %v442_v52 = vadd.f32 %v2693_v24, %v441_v51 }
  0xde   : > { %v511_v54 = vmax.f32 %v442_v52, 0.0  ;;  %v545_v52 = vpack.c.bf16 %v523_v49, %v522_v48 }
  0xe0   : > { %v539_v55 = vpack.c.bf16 %v511_v54, %v510_v53  ;;  %v481_v54 = vpop.f32.mrf.mxu3 }
  0xe1   : > { %v482_v7 = vadd.f32 %v2693_v24, %v481_v54 }
  0xe2   : > { %2181 = vmatmul.msk.bf16.gmra.mxu1 %vm602_vm2, %v539_v55  ;;  %v476_v53 = vpop.f32.mrf.mxu2 }
  0xe3   : > { %v444_v56 = vpop.f32.mrf.mxu0  ;;  %v477_v58 = vadd.f32 %v2693_v24, %v476_v53  ;;  %v527_v13 = vmax.f32 %v482_v7, 0.0 }
  0xe4   : > { %v445_v59 = vadd.f32 %v2693_v24, %v444_v56 }
  0xe5   : > { %v547_v16 = vpack.c.bf16 %v527_v13, %v526_v12 }
  0xe6   : > { %v512_v62 = vmax.f32 %v445_v59, 0.0 }
  0xe8   : > { %v484_v2 = vpop.f32.mrf.mxu3 }
  0xe9   : > { %v485_v20 = vadd.f32 %v2693_v24, %v484_v2 }
  0xeb   : > { %v446_v60 = vpop.f32.mrf.mxu0  ;;  %v528_v26 = vmax.f32 %v485_v20, 0.0 }
  0xec   : > { %v447_v61 = vadd.f32 %v2693_v24, %v446_v60 }
  0xee   : > { %v513_v63 = vmax.f32 %v447_v61, 0.0 }
  0xf0   : > { %v540_v0 = vpack.c.bf16 %v513_v63, %v512_v62  ;;  %v524_v62 = vmax.f32 %v475_v57, 0.0  ;;  %v525_v63 = vmax.f32 %v477_v58, 0.0  ;;  %v486_v9 = vpop.f32.mrf.mxu3 }
  0xf1   : > { %v487_v21 = vadd.f32 %v2693_v24, %v486_v9 }
  0xf2   : > { %2182 = vmatmul.msk.bf16.gmra.mxu1 %vm602_vm2, %v540_v0  ;;  %v546_v3 = vpack.c.bf16 %v525_v63, %v524_v62  ;;  %v2423_v63 = vld [vmem:[%s3385_s2 + $0x88] sm:$0xff] }
  0xf3   : > { %v529_v27 = vmax.f32 %v487_v21, 0.0  ;;  %1125 = vmatpush.bf16.msrb.mxu3 %v2423_v63 }
  0xf5   : > { %v548_v31 = vpack.c.bf16 %v529_v27, %v528_v26 }
  0xf8   : > { %v489_v17 = vpop.f32.mrf.mxu3 }
 0x102   : > { %2183 = vmatmul.msk.bf16.gmra.mxu1 %vm602_vm2, %v541_v8 }
 0x112   : > { %2184 = vmatmul.msk.bf16.gmra.mxu1 %vm602_vm2, %v542_v18 }
 0x122   : > { %2185 = vmatmul.msk.bf16.gmra.mxu1 %vm602_vm2, %v543_v29  ;;  %v491_v29 = vpop.f32.mrf.mxu3 }
 0x12a   : > { %v494_v34 = vpop.f32.mrf.mxu3 }
 0x12b   : > { %v495_v49 = vadd.f32 %v2693_v24, %v494_v34 }
 0x12f   : > { %v660_v35 = vpop.f32.mrf.mxu1 }
 0x130   : > { %v661_v39 = vadd.f32 %v2752_v38, %v660_v35  ;;  %v490_v35 = vadd.f32 %v2693_v24, %v489_v17 }
 0x132   : > { %2186 = vmatmul.msk.bf16.gmra.mxu1 %vm602_vm2, %v544_v36  ;;  %v740_v44 = vmax.f32 %v661_v39, 0.0  ;;  %v492_v36 = vadd.f32 %v2693_v24, %v491_v29  ;;  %v530_v41 = vmax.f32 %v490_v35, 0.0  ;;  %v496_v46 = vpop.f32.mrf.mxu3 }
 0x134   : > { %v531_v42 = vmax.f32 %v492_v36, 0.0 }
 0x137   : > { %v662_v40 = vpop.f32.mrf.mxu1 }
 0x138   : > { %v663_v43 = vadd.f32 %v2752_v38, %v662_v40 }
 0x13a   : > { %v741_v45 = vmax.f32 %v663_v43, 0.0  ;;  %v499_v54 = vpop.f32.mrf.mxu3 }
 0x13c   : > { %v772_v50 = vpack.c.bf16 %v741_v45, %v740_v44  ;;  %v549_v45 = vpack.c.bf16 %v531_v42, %v530_v41 }
 0x13e   : > { %2230 = vmatmul.msk.bf16.vlgmr.msrb.gmra.mxu2 %vm602_vm2, %v772_v50  ;;  %v497_v50 = vadd.f32 %v2693_v24, %v496_v46 }
 0x13f   : > { %v665_v51 = vpop.f32.mrf.mxu1 }
 0x140   : > { %v666_v55 = vadd.f32 %v2752_v38, %v665_v51 }
 0x142   : > { %2187 = vmatmul.msk.bf16.gmra.mxu1 %vm602_vm2, %v545_v52  ;;  %v742_v60 = vmax.f32 %v666_v55, 0.0  ;;  %v532_v55 = vmax.f32 %v495_v49, 0.0 }
 0x147   : > { %v667_v56 = vpop.f32.mrf.mxu1 }
 0x148   : > { %v668_v59 = vadd.f32 %v2752_v38, %v667_v56  ;;  %v533_v56 = vmax.f32 %v497_v50, 0.0 }
 0x14a   : > { %v743_v61 = vmax.f32 %v668_v59, 0.0  ;;  %v550_v59 = vpack.c.bf16 %v533_v56, %v532_v55 }
 0x14c   : > { %v773_v0 = vpack.c.bf16 %v743_v61, %v742_v60  ;;  %v501_v60 = vpop.f32.mrf.mxu3 }
 0x14e   : > { %2231 = vmatmul.msk.bf16.gmra.mxu2 %vm602_vm2, %v773_v0  ;;  %v500_v0 = vadd.f32 %v2693_v24, %v499_v54 }
 0x14f   : > { %v670_v1 = vpop.f32.mrf.mxu1 }
 0x150   : > { %v671_v4 = vadd.f32 %v2752_v38, %v670_v1  ;;  %v502_v1 = vadd.f32 %v2693_v24, %v501_v60  ;;  %v534_v6 = vmax.f32 %v500_v0, 0.0  ;;  %v2421_v24 = vld [vmem:[%s3385_s2 + $0x78] sm:$0xff] }
 0x152   : > { %2188 = vmatmul.msk.bf16.gmra.mxu1 %vm602_vm2, %v546_v3  ;;  %v744_v10 = vmax.f32 %v671_v4, 0.0  ;;  %v535_v7 = vmax.f32 %v502_v1, 0.0 }
 0x157   : > { %v672_v5 = vpop.f32.mrf.mxu1 }
 0x158   : > { %v673_v8 = vadd.f32 %v2752_v38, %v672_v5  ;;  %v2422_v5 = vld [vmem:[%s3385_s2 + $0x80] sm:$0xff] }
 0x159   : > { %1126 = vmatpush.bf16.msrb.mxu3 %v2422_v5 }
 0x15a   : > { %v745_v11 = vmax.f32 %v673_v8, 0.0 }
 0x15c   : > { %v774_v14 = vpack.c.bf16 %v745_v11, %v744_v10  ;;  %v551_v10 = vpack.c.bf16 %v535_v7, %v534_v6  ;;  %v2420_v11 = vld [vmem:[%s3385_s2 + $0x70] sm:$0xff] }
 0x15d   : > { %1127 = vmatpush.bf16.msrb.mxu3 %v2421_v24 }
 0x15e   : > { %2232 = vmatmul.msk.bf16.gmra.mxu2 %vm602_vm2, %v774_v14  ;;  %v2419_v14 = vld [vmem:[%s3385_s2 + $0x68] sm:$0xff] }
 0x15f   : > { %v675_v15 = vpop.f32.mrf.mxu1 }
 0x160   : > { %v676_v18 = vadd.f32 %v2752_v38, %v675_v15 }
 0x161   : > { %1128 = vmatpush.bf16.msrb.mxu3 %v2420_v11 }
 0x162   : > { %2189 = vmatmul.msk.bf16.gmra.mxu1 %vm602_vm2, %v547_v16  ;;  %v746_v23 = vmax.f32 %v676_v18, 0.0  ;;  %v2418_v18 = vld [vmem:[%s3385_s2 + $0x60] sm:$0xff] }
 0x165   : > { %1129 = vmatpush.bf16.msrb.mxu3 %v2419_v14 }
 0x167   : > { %v677_v19 = vpop.f32.mrf.mxu1 }
 0x168   : > { %v678_v22 = vadd.f32 %v2752_v38, %v677_v19 }
 0x169   : > { %1130 = vmatpush.bf16.msrb.mxu3 %v2418_v18 }
 0x16a   : > { %v747_v25 = vmax.f32 %v678_v22, 0.0 }
 0x16c   : > { %v775_v28 = vpack.c.bf16 %v747_v25, %v746_v23 }
 0x16e   : > { %2233 = vmatmul.msk.bf16.gmra.mxu2 %vm602_vm2, %v775_v28 }
 0x16f   : > { %v680_v30 = vpop.f32.mrf.mxu1 }
 0x170   : > { %v681_v32 = vadd.f32 %v2752_v38, %v680_v30  ;;  %v2824_v30 = vld [vmem:[%s3386_s3 + $0x2] ss:$0 sm:$0xff] }
 0x172   : > { %2190 = vmatmul.msk.bf16.gmra.mxu1 %vm602_vm2, %v548_v31  ;;  %v748_v39 = vmax.f32 %v681_v32, 0.0 }
 0x177   : > { %v682_v33 = vpop.f32.mrf.mxu1 }
 0x178   : > { %v683_v37 = vadd.f32 %v2752_v38, %v682_v33 }
 0x17a   : > { %v749_v40 = vmax.f32 %v683_v37, 0.0 }
 0x17c   : > { %v776_v43 = vpack.c.bf16 %v749_v40, %v748_v39 }
 0x17e   : > { %2234 = vmatmul.msk.bf16.gmra.mxu2 %vm602_vm2, %v776_v43 }
 0x17f   : > { %v685_v44 = vpop.f32.mrf.mxu1 }
 0x180   : > { %v686_v47 = vadd.f32 %v2752_v38, %v685_v44 }
 0x182   : > { %2191 = vmatmul.msk.bf16.gmra.mxu1 %vm602_vm2, %v549_v45  ;;  %v750_v52 = vmax.f32 %v686_v47, 0.0 }
 0x187   : > { %v687_v48 = vpop.f32.mrf.mxu1 }
 0x188   : > { %v688_v51 = vadd.f32 %v2752_v38, %v687_v48 }
 0x18a   : > { %v751_v53 = vmax.f32 %v688_v51, 0.0 }
 0x18c   : > { %v777_v57 = vpack.c.bf16 %v751_v53, %v750_v52 }
 0x18e   : > { %2235 = vmatmul.msk.bf16.gmra.mxu2 %vm602_vm2, %v777_v57 }
 0x18f   : > { %v690_v58 = vpop.f32.mrf.mxu1 }
 0x190   : > { %v691_v61 = vadd.f32 %v2752_v38, %v690_v58 }
 0x192   : > { %2192 = vmatmul.msk.bf16.gmra.mxu1 %vm602_vm2, %v550_v59  ;;  %v752_v3 = vmax.f32 %v691_v61, 0.0 }
 0x197   : > { %v692_v62 = vpop.f32.mrf.mxu1 }
 0x198   : > { %v693_v2 = vadd.f32 %v2752_v38, %v692_v62 }
 0x19a   : > { %v753_v4 = vmax.f32 %v693_v2, 0.0 }
 0x19c   : > { %v778_v8 = vpack.c.bf16 %v753_v4, %v752_v3 }
 0x19e   : > { %2236 = vmatmul.msk.bf16.gmra.mxu2 %vm602_vm2, %v778_v8 }
 0x19f   : > { %v695_v9 = vpop.f32.mrf.mxu1 }
 0x1a0   : > { %v696_v12 = vadd.f32 %v2752_v38, %v695_v9 }
 0x1a2   : > { %2193 = vmatmul.msk.bf16.gmra.mxu1 %vm602_vm2, %v551_v10  ;;  %v754_v16 = vmax.f32 %v696_v12, 0.0 }
 0x1a7   : > { %v697_v13 = vpop.f32.mrf.mxu1 }
 0x1a8   : > { %v698_v15 = vadd.f32 %v2752_v38, %v697_v13 }
 0x1aa   : > { %v755_v17 = vmax.f32 %v698_v15, 0.0 }
 0x1ac   : > { %v779_v19 = vpack.c.bf16 %v755_v17, %v754_v16 }
 0x1ae   : > { %2237 = vmatmul.msk.bf16.gmra.mxu2 %vm602_vm2, %v779_v19 }
 0x1af   : > { %v700_v20 = vpop.f32.mrf.mxu1 }
 0x1b0   : > { %v701_v21 = vadd.f32 %v2752_v38, %v700_v20 }
 0x1b2   : > { %v756_v25 = vmax.f32 %v701_v21, 0.0 }
 0x1b7   : > { %v702_v22 = vpop.f32.mrf.mxu1 }
 0x1b8   : > { %v703_v23 = vadd.f32 %v2752_v38, %v702_v22 }
 0x1ba   : > { %v757_v26 = vmax.f32 %v703_v23, 0.0 }
 0x1bc   : > { %v780_v27 = vpack.c.bf16 %v757_v26, %v756_v25 }
 0x1be   : > { %2238 = vmatmul.msk.bf16.gmra.mxu2 %vm602_vm2, %v780_v27 }
 0x1bf   : > { %v705_v28 = vpop.f32.mrf.mxu1 }
 0x1c0   : > { %v706_v31 = vadd.f32 %v2752_v38, %v705_v28 }
 0x1c1   : > { %v896_v29 = vpop.f32.mrf.mxu2 }
 0x1c2   : > { %v897_v33 = vadd.f32 %v2824_v30, %v896_v29  ;;  %v758_v36 = vmax.f32 %v706_v31, 0.0 }
 0x1c4   : > { %v976_v40 = vmax.f32 %v897_v33, 0.0 }
 0x1c7   : > { %v707_v32 = vpop.f32.mrf.mxu1 }
 0x1c8   : > { %v708_v34 = vadd.f32 %v2752_v38, %v707_v32 }
 0x1c9   : > { %v898_v35 = vpop.f32.mrf.mxu2 }
 0x1ca   : > { %v759_v37 = vmax.f32 %v708_v34, 0.0  ;;  %v899_v39 = vadd.f32 %v2824_v30, %v898_v35 }
 0x1cc   : > { %v781_v41 = vpack.c.bf16 %v759_v37, %v758_v36  ;;  %v977_v42 = vmax.f32 %v899_v39, 0.0 }
 0x1ce   : > { %v1008_v43 = vpack.c.bf16 %v977_v42, %v976_v40  ;;  %2239 = vmatmul.msk.bf16.gmra.mxu2 %vm602_vm2, %v781_v41 }
 0x1cf   : > { %v710_v44 = vpop.f32.mrf.mxu1 }
 0x1d0   : > { %2282 = vmatmul.msk.bf16.vlgmr.msrb.gmra.mxu3 %vm602_vm2, %v1008_v43  ;;  %v711_v46 = vadd.f32 %v2752_v38, %v710_v44 }
 0x1d1   : > { %v901_v45 = vpop.f32.mrf.mxu2 }
 0x1d2   : > { %v902_v48 = vadd.f32 %v2824_v30, %v901_v45  ;;  %v760_v51 = vmax.f32 %v711_v46, 0.0 }
 0x1d4   : > { %v978_v54 = vmax.f32 %v902_v48, 0.0 }
 0x1d7   : > { %v712_v47 = vpop.f32.mrf.mxu1 }
 0x1d8   : > { %v713_v49 = vadd.f32 %v2752_v38, %v712_v47 }
 0x1d9   : > { %v903_v50 = vpop.f32.mrf.mxu2 }
 0x1da   : > { %v761_v52 = vmax.f32 %v713_v49, 0.0  ;;  %v904_v53 = vadd.f32 %v2824_v30, %v903_v50 }
 0x1dc   : > { %v782_v55 = vpack.c.bf16 %v761_v52, %v760_v51  ;;  %v979_v56 = vmax.f32 %v904_v53, 0.0 }
 0x1de   : > { %2240 = vmatmul.msk.bf16.gmra.mxu2 %vm602_vm2, %v782_v55  ;;  %v1009_v57 = vpack.c.bf16 %v979_v56, %v978_v54 }
 0x1df   : > { %v715_v58 = vpop.f32.mrf.mxu1 }
 0x1e0   : > { %2283 = vmatmul.msk.bf16.gmra.mxu3 %vm602_vm2, %v1009_v57  ;;  %v716_v60 = vadd.f32 %v2752_v38, %v715_v58 }
 0x1e1   : > { %v906_v59 = vpop.f32.mrf.mxu2 }
 0x1e2   : > { %v907_v62 = vadd.f32 %v2824_v30, %v906_v59  ;;  %v762_v1 = vmax.f32 %v716_v60, 0.0  ;;  %v2429_v59 = vld [vmem:[%s3385_s2 + $0xb8] sm:$0xff] }
 0x1e3   : > { %1361 = vmatpush.bf16.msrb.mxu0 %v2429_v59 }
 0x1e4   : > { %v980_v4 = vmax.f32 %v907_v62, 0.0 }
 0x1e7   : > { %v717_v61 = vpop.f32.mrf.mxu1 }
 0x1e8   : > { %v718_v63 = vadd.f32 %v2752_v38, %v717_v61 }
 0x1e9   : > { %v908_v0 = vpop.f32.mrf.mxu2 }
 0x1ea   : > { %v763_v2 = vmax.f32 %v718_v63, 0.0  ;;  %v909_v3 = vadd.f32 %v2824_v30, %v908_v0 }
 0x1ec   : > { %v783_v5 = vpack.c.bf16 %v763_v2, %v762_v1  ;;  %v981_v6 = vmax.f32 %v909_v3, 0.0  ;;  %v2428_v2 = vld [vmem:[%s3385_s2 + $0xb0] sm:$0xff] }
 0x1ed   : > { %1362 = vmatpush.bf16.msrb.mxu0 %v2428_v2 }
 0x1ee   : > { %2241 = vmatmul.msk.bf16.gmra.mxu2 %vm602_vm2, %v783_v5  ;;  %v1010_v7 = vpack.c.bf16 %v981_v6, %v980_v4  ;;  %v2427_v4 = vld [vmem:[%s3385_s2 + $0xa8] sm:$0xff]  ;;  %v2426_v5 = vld [vmem:[%s3385_s2 + $0xa0] sm:$0xff] }
 0x1ef   : > { %v720_v8 = vpop.f32.mrf.mxu1 }
 0x1f0   : > { %2284 = vmatmul.msk.bf16.gmra.mxu3 %vm602_vm2, %v1010_v7  ;;  %v721_v24 = vadd.f32 %v2752_v38, %v720_v8  ;;  %v2425_v8 = vld [vmem:[%s3385_s2 + $0x98] sm:$0xff] }
 0x1f1   : > { %v911_v9 = vpop.f32.mrf.mxu2  ;;  %1363 = vmatpush.bf16.msrb.mxu0 %v2427_v4 }
 0x1f2   : > { %v912_v11 = vadd.f32 %v2824_v30, %v911_v9  ;;  %v764_v14 = vmax.f32 %v721_v24, 0.0 }
 0x1f4   : > { %v982_v17 = vmax.f32 %v912_v11, 0.0  ;;  %v2424_v11 = vld [vmem:[%s3385_s2 + $0x90] sm:$0xff] }
 0x1f5   : > { %1364 = vmatpush.bf16.msrb.mxu0 %v2426_v5 }
 0x1f7   : > { %v722_v10 = vpop.f32.mrf.mxu1 }
 0x1f8   : > { %v723_v12 = vadd.f32 %v2752_v38, %v722_v10 }
 0x1f9   : > { %v913_v13 = vpop.f32.mrf.mxu2  ;;  %1365 = vmatpush.bf16.msrb.mxu0 %v2425_v8 }
 0x1fa   : > { %v765_v15 = vmax.f32 %v723_v12, 0.0  ;;  %v914_v16 = vadd.f32 %v2824_v30, %v913_v13 }
 0x1fc   : > { %v784_v18 = vpack.c.bf16 %v765_v15, %v764_v14  ;;  %v983_v19 = vmax.f32 %v914_v16, 0.0 }
 0x1fd   : > { %1366 = vmatpush.bf16.msrb.mxu0 %v2424_v11 }
 0x1fe   : > { %2242 = vmatmul.msk.bf16.gmra.mxu2 %vm602_vm2, %v784_v18  ;;  %v1011_v20 = vpack.c.bf16 %v983_v19, %v982_v17 }
 0x1ff   : > { %v725_v21 = vpop.f32.mrf.mxu1 }
 0x200   : > { %2285 = vmatmul.msk.bf16.gmra.mxu3 %vm602_vm2, %v1011_v20  ;;  %v726_v23 = vadd.f32 %v2752_v38, %v725_v21 }
 0x201   : > { %v916_v22 = vpop.f32.mrf.mxu2 }
 0x202   : > { %v917_v26 = vadd.f32 %v2824_v30, %v916_v22  ;;  %v766_v29 = vmax.f32 %v726_v23, 0.0  ;;  %v2895_v22 = vld [vmem:[%s3386_s3 + $0x3] ss:$0 sm:$0xff] }
 0x204   : > { %v984_v33 = vmax.f32 %v917_v26, 0.0 }
 0x207   : > { %v727_v25 = vpop.f32.mrf.mxu1 }
 0x208   : > { %v728_v27 = vadd.f32 %v2752_v38, %v727_v25 }
 0x209   : > { %v918_v28 = vpop.f32.mrf.mxu2 }
 0x20a   : > { %v767_v31 = vmax.f32 %v728_v27, 0.0  ;;  %v919_v32 = vadd.f32 %v2824_v30, %v918_v28 }
 0x20c   : > { %v785_v34 = vpack.c.bf16 %v767_v31, %v766_v29  ;;  %v985_v35 = vmax.f32 %v919_v32, 0.0 }
 0x20e   : > { %v1012_v36 = vpack.c.bf16 %v985_v35, %v984_v33  ;;  %2243 = vmatmul.msk.bf16.gmra.mxu2 %vm602_vm2, %v785_v34 }
 0x20f   : > { %v730_v37 = vpop.f32.mrf.mxu1 }
 0x210   : > { %2286 = vmatmul.msk.bf16.gmra.mxu3 %vm602_vm2, %v1012_v36  ;;  %v731_v40 = vadd.f32 %v2752_v38, %v730_v37 }
 0x211   : > { %v921_v39 = vpop.f32.mrf.mxu2 }
 0x212   : > { %v922_v42 = vadd.f32 %v2824_v30, %v921_v39  ;;  %v768_v45 = vmax.f32 %v731_v40, 0.0 }
 0x214   : > { %v986_v48 = vmax.f32 %v922_v42, 0.0 }
 0x217   : > { %v732_v41 = vpop.f32.mrf.mxu1 }
 0x218   : > { %v733_v43 = vadd.f32 %v2752_v38, %v732_v41 }
 0x219   : > { %v923_v44 = vpop.f32.mrf.mxu2 }
 0x21a   : > { %v769_v46 = vmax.f32 %v733_v43, 0.0  ;;  %v924_v47 = vadd.f32 %v2824_v30, %v923_v44 }
 0x21c   : > { %v786_v49 = vpack.c.bf16 %v769_v46, %v768_v45  ;;  %v987_v50 = vmax.f32 %v924_v47, 0.0 }
 0x21e   : > { %v1013_v51 = vpack.c.bf16 %v987_v50, %v986_v48  ;;  %2244 = vmatmul.msk.bf16.gmra.mxu2 %vm602_vm2, %v786_v49 }
 0x21f   : > { %v735_v52 = vpop.f32.mrf.mxu1 }
 0x220   : > { %2287 = vmatmul.msk.bf16.gmra.mxu3 %vm602_vm2, %v1013_v51  ;;  %v736_v54 = vadd.f32 %v2752_v38, %v735_v52 }
 0x221   : > { %v926_v53 = vpop.f32.mrf.mxu2 }
 0x222   : > { %v927_v56 = vadd.f32 %v2824_v30, %v926_v53  ;;  %v770_v60 = vmax.f32 %v736_v54, 0.0 }
 0x224   : > { %v988_v63 = vmax.f32 %v927_v56, 0.0 }
 0x227   : > { %v737_v55 = vpop.f32.mrf.mxu1 }
 0x228   : > { %v738_v57 = vadd.f32 %v2752_v38, %v737_v55 }
 0x229   : > { %v928_v58 = vpop.f32.mrf.mxu2 }
 0x22a   : > { %v771_v61 = vmax.f32 %v738_v57, 0.0  ;;  %v929_v62 = vadd.f32 %v2824_v30, %v928_v58 }
 0x22c   : > { %v787_v0 = vpack.c.bf16 %v771_v61, %v770_v60  ;;  %v989_v1 = vmax.f32 %v929_v62, 0.0 }
 0x22e   : > { %v1014_v3 = vpack.c.bf16 %v989_v1, %v988_v63  ;;  %2245 = vmatmul.msk.bf16.gmra.mxu2 %vm602_vm2, %v787_v0 }
 0x230   : > { %2288 = vmatmul.msk.bf16.gmra.mxu3 %vm602_vm2, %v1014_v3 }
 0x231   : > { %v931_v38 = vpop.f32.mrf.mxu2 }
 0x232   : > { %v932_v6 = vadd.f32 %v2824_v30, %v931_v38 }
 0x234   : > { %v990_v24 = vmax.f32 %v932_v6, 0.0 }
 0x239   : > { %v933_v7 = vpop.f32.mrf.mxu2 }
 0x23a   : > { %v934_v9 = vadd.f32 %v2824_v30, %v933_v7 }
 0x23c   : > { %v991_v10 = vmax.f32 %v934_v9, 0.0 }
 0x23e   : > { %v1015_v12 = vpack.c.bf16 %v991_v10, %v990_v24 }
 0x240   : > { %2289 = vmatmul.msk.bf16.gmra.mxu3 %vm602_vm2, %v1015_v12 }
 0x241   : > { %v936_v13 = vpop.f32.mrf.mxu2 }
 0x242   : > { %v937_v14 = vadd.f32 %v2824_v30, %v936_v13 }
 0x244   : > { %v992_v17 = vmax.f32 %v937_v14, 0.0 }
 0x249   : > { %v938_v15 = vpop.f32.mrf.mxu2 }
 0x24a   : > { %v939_v16 = vadd.f32 %v2824_v30, %v938_v15 }
 0x24c   : > { %v993_v18 = vmax.f32 %v939_v16, 0.0 }
 0x24e   : > { %v1016_v19 = vpack.c.bf16 %v993_v18, %v992_v17 }
 0x250   : > { %2290 = vmatmul.msk.bf16.gmra.mxu3 %vm602_vm2, %v1016_v19 }
 0x251   : > { %v941_v20 = vpop.f32.mrf.mxu2 }
 0x252   : > { %v942_v23 = vadd.f32 %v2824_v30, %v941_v20 }
 0x253   : > { %v1132_v21 = vpop.f32.mrf.mxu3 }
 0x254   : > { %v1133_v26 = vadd.f32 %v2895_v22, %v1132_v21  ;;  %v994_v29 = vmax.f32 %v942_v23, 0.0 }
 0x256   : > { %v1212_v33 = vmax.f32 %v1133_v26, 0.0 }
 0x259   : > { %v943_v25 = vpop.f32.mrf.mxu2 }
 0x25a   : > { %v944_v27 = vadd.f32 %v2824_v30, %v943_v25 }
 0x25b   : > { %v1134_v28 = vpop.f32.mrf.mxu3 }
 0x25c   : > { %v995_v31 = vmax.f32 %v944_v27, 0.0  ;;  %v1135_v32 = vadd.f32 %v2895_v22, %v1134_v28 }
 0x25e   : > { %v1017_v34 = vpack.c.bf16 %v995_v31, %v994_v29  ;;  %v1213_v35 = vmax.f32 %v1135_v32, 0.0 }
 0x260   : > { %v1244_v36 = vpack.c.bf16 %v1213_v35, %v1212_v33  ;;  %2291 = vmatmul.msk.bf16.gmra.mxu3 %vm602_vm2, %v1017_v34 }
 0x261   : > { %v946_v37 = vpop.f32.mrf.mxu2 }
 0x262   : > { %2334 = vmatmul.msk.bf16.vlgmr.msrb.gmra.mxu0 %vm602_vm2, %v1244_v36  ;;  %v947_v40 = vadd.f32 %v2824_v30, %v946_v37 }
 0x263   : > { %v1137_v39 = vpop.f32.mrf.mxu3 }
 0x264   : > { %v1138_v42 = vadd.f32 %v2895_v22, %v1137_v39  ;;  %v996_v45 = vmax.f32 %v947_v40, 0.0 }
 0x266   : > { %v1214_v48 = vmax.f32 %v1138_v42, 0.0 }
 0x269   : > { %v948_v41 = vpop.f32.mrf.mxu2 }
 0x26a   : > { %v949_v43 = vadd.f32 %v2824_v30, %v948_v41 }
 0x26b   : > { %v1139_v44 = vpop.f32.mrf.mxu3 }
 0x26c   : > { %v997_v46 = vmax.f32 %v949_v43, 0.0  ;;  %v1140_v47 = vadd.f32 %v2895_v22, %v1139_v44 }
 0x26e   : > { %v1018_v49 = vpack.c.bf16 %v997_v46, %v996_v45  ;;  %v1215_v50 = vmax.f32 %v1140_v47, 0.0 }
 0x270   : > { %2292 = vmatmul.msk.bf16.gmra.mxu3 %vm602_vm2, %v1018_v49  ;;  %v1245_v51 = vpack.c.bf16 %v1215_v50, %v1214_v48 }
 0x271   : > { %v951_v52 = vpop.f32.mrf.mxu2 }
 0x272   : > { %2335 = vmatmul.msk.bf16.gmra.mxu0 %vm602_vm2, %v1245_v51  ;;  %v952_v54 = vadd.f32 %v2824_v30, %v951_v52 }
 0x273   : > { %v1142_v53 = vpop.f32.mrf.mxu3 }
 0x274   : > { %v1143_v56 = vadd.f32 %v2895_v22, %v1142_v53  ;;  %v998_v59 = vmax.f32 %v952_v54, 0.0 }
 0x276   : > { %v1216_v62 = vmax.f32 %v1143_v56, 0.0 }
 0x279   : > { %v953_v55 = vpop.f32.mrf.mxu2 }
 0x27a   : > { %v954_v57 = vadd.f32 %v2824_v30, %v953_v55 }
 0x27b   : > { %v1144_v58 = vpop.f32.mrf.mxu3 }
 0x27c   : > { %v999_v60 = vmax.f32 %v954_v57, 0.0  ;;  %v1145_v61 = vadd.f32 %v2895_v22, %v1144_v58 }
 0x27e   : > { %v1019_v63 = vpack.c.bf16 %v999_v60, %v998_v59  ;;  %v1217_v0 = vmax.f32 %v1145_v61, 0.0 }
 0x280   : > { %2293 = vmatmul.msk.bf16.gmra.mxu3 %vm602_vm2, %v1019_v63  ;;  %v1246_v1 = vpack.c.bf16 %v1217_v0, %v1216_v62 }
 0x281   : > { %v956_v2 = vpop.f32.mrf.mxu2 }
 0x282   : > { %2336 = vmatmul.msk.bf16.gmra.mxu0 %vm602_vm2, %v1246_v1  ;;  %v957_v38 = vadd.f32 %v2824_v30, %v956_v2 }
 0x283   : > { %v1147_v3 = vpop.f32.mrf.mxu3 }
 0x284   : > { %v1148_v5 = vadd.f32 %v2895_v22, %v1147_v3  ;;  %v1000_v8 = vmax.f32 %v957_v38, 0.0 }
 0x286   : > { %v1218_v10 = vmax.f32 %v1148_v5, 0.0  ;;  %v2947_v5 = vld [vmem:[%s3386_s3 + $0x4] ss:$0 sm:$0xff] }
 0x289   : > { %v958_v4 = vpop.f32.mrf.mxu2 }
 0x28a   : > { %v959_v6 = vadd.f32 %v2824_v30, %v958_v4 }
 0x28b   : > { %v1149_v7 = vpop.f32.mrf.mxu3 }
 0x28c   : > { %v1001_v9 = vmax.f32 %v959_v6, 0.0  ;;  %v1150_v24 = vadd.f32 %v2895_v22, %v1149_v7 }
 0x28e   : > { %v1020_v11 = vpack.c.bf16 %v1001_v9, %v1000_v8  ;;  %v1219_v12 = vmax.f32 %v1150_v24, 0.0 }
 0x290   : > { %2294 = vmatmul.msk.bf16.gmra.mxu3 %vm602_vm2, %v1020_v11  ;;  %v1247_v13 = vpack.c.bf16 %v1219_v12, %v1218_v10 }
 0x291   : > { %v961_v14 = vpop.f32.mrf.mxu2 }
 0x292   : > { %2337 = vmatmul.msk.bf16.gmra.mxu0 %vm602_vm2, %v1247_v13  ;;  %v962_v16 = vadd.f32 %v2824_v30, %v961_v14 }
 0x293   : > { %v1152_v15 = vpop.f32.mrf.mxu3 }
 0x294   : > { %v1153_v18 = vadd.f32 %v2895_v22, %v1152_v15  ;;  %v1002_v21 = vmax.f32 %v962_v16, 0.0 }
 0x296   : > { %v1220_v26 = vmax.f32 %v1153_v18, 0.0 }
 0x299   : > { %v963_v17 = vpop.f32.mrf.mxu2 }
 0x29a   : > { %v964_v19 = vadd.f32 %v2824_v30, %v963_v17 }
 0x29b   : > { %v1154_v20 = vpop.f32.mrf.mxu3 }
 0x29c   : > { %v1003_v23 = vmax.f32 %v964_v19, 0.0  ;;  %v1155_v25 = vadd.f32 %v2895_v22, %v1154_v20 }
 0x29e   : > { %v1021_v27 = vpack.c.bf16 %v1003_v23, %v1002_v21  ;;  %v1221_v28 = vmax.f32 %v1155_v25, 0.0 }
 0x2a0   : > { %v1248_v29 = vpack.c.bf16 %v1221_v28, %v1220_v26  ;;  %2295 = vmatmul.msk.bf16.gmra.mxu3 %vm602_vm2, %v1021_v27 }
 0x2a1   : > { %v966_v31 = vpop.f32.mrf.mxu2 }
 0x2a2   : > { %2338 = vmatmul.msk.bf16.gmra.mxu0 %vm602_vm2, %v1248_v29  ;;  %v967_v33 = vadd.f32 %v2824_v30, %v966_v31 }
 0x2a3   : > { %v1157_v32 = vpop.f32.mrf.mxu3 }
 0x2a4   : > { %v1158_v35 = vadd.f32 %v2895_v22, %v1157_v32  ;;  %v1004_v39 = vmax.f32 %v967_v33, 0.0 }
 0x2a6   : > { %v1222_v42 = vmax.f32 %v1158_v35, 0.0 }
 0x2a9   : > { %v968_v34 = vpop.f32.mrf.mxu2 }
 0x2aa   : > { %v969_v36 = vadd.f32 %v2824_v30, %v968_v34 }
 0x2ab   : > { %v1159_v37 = vpop.f32.mrf.mxu3 }
 0x2ac   : > { %v1005_v40 = vmax.f32 %v969_v36, 0.0  ;;  %v1160_v41 = vadd.f32 %v2895_v22, %v1159_v37 }
 0x2ae   : > { %v1022_v43 = vpack.c.bf16 %v1005_v40, %v1004_v39  ;;  %v1223_v44 = vmax.f32 %v1160_v41, 0.0 }
 0x2b0   : > { %v1249_v45 = vpack.c.bf16 %v1223_v44, %v1222_v42  ;;  %2296 = vmatmul.msk.bf16.gmra.mxu3 %vm602_vm2, %v1022_v43 }
 0x2b1   : > { %v971_v46 = vpop.f32.mrf.mxu2 }
 0x2b2   : > { %2339 = vmatmul.msk.bf16.gmra.mxu0 %vm602_vm2, %v1249_v45  ;;  %v972_v48 = vadd.f32 %v2824_v30, %v971_v46 }
 0x2b3   : > { %v1162_v47 = vpop.f32.mrf.mxu3 }
 0x2b4   : > { %v1163_v50 = vadd.f32 %v2895_v22, %v1162_v47  ;;  %v1006_v53 = vmax.f32 %v972_v48, 0.0 }
 0x2b6   : > { %v1224_v56 = vmax.f32 %v1163_v50, 0.0 }
 0x2b9   : > { %v973_v49 = vpop.f32.mrf.mxu2 }
 0x2ba   : > { %v974_v51 = vadd.f32 %v2824_v30, %v973_v49 }
 0x2bb   : > { %v1164_v52 = vpop.f32.mrf.mxu3 }
 0x2bc   : > { %v1007_v54 = vmax.f32 %v974_v51, 0.0  ;;  %v1165_v55 = vadd.f32 %v2895_v22, %v1164_v52 }
 0x2be   : > { %v1023_v57 = vpack.c.bf16 %v1007_v54, %v1006_v53  ;;  %v1225_v58 = vmax.f32 %v1165_v55, 0.0 }
 0x2c0   : > { %v1250_v59 = vpack.c.bf16 %v1225_v58, %v1224_v56  ;;  %2297 = vmatmul.msk.bf16.gmra.mxu3 %vm602_vm2, %v1023_v57 }
 0x2c2   : > { %2340 = vmatmul.msk.bf16.gmra.mxu0 %vm602_vm2, %v1250_v59 }
 0x2c3   : > { %v1167_v60 = vpop.f32.mrf.mxu3 }
 0x2c4   : > { %v1168_v61 = vadd.f32 %v2895_v22, %v1167_v60 }
 0x2c6   : > { %v1226_v30 = vmax.f32 %v1168_v61, 0.0 }
 0x2cb   : > { %v1169_v62 = vpop.f32.mrf.mxu3 }
 0x2cc   : > { %v1170_v63 = vadd.f32 %v2895_v22, %v1169_v62 }
 0x2ce   : > { %v1227_v0 = vmax.f32 %v1170_v63, 0.0 }
 0x2d0   : > { %v1251_v1 = vpack.c.bf16 %v1227_v0, %v1226_v30 }
 0x2d2   : > { %2341 = vmatmul.msk.bf16.gmra.mxu0 %vm602_vm2, %v1251_v1 }
 0x2d3   : > { %v1172_v2 = vpop.f32.mrf.mxu3 }
 0x2d4   : > { %v1173_v3 = vadd.f32 %v2895_v22, %v1172_v2 }
 0x2d6   : > { %v1228_v6 = vmax.f32 %v1173_v3, 0.0 }
 0x2db   : > { %v1174_v38 = vpop.f32.mrf.mxu3 }
 0x2dc   : > { %v1175_v4 = vadd.f32 %v2895_v22, %v1174_v38 }
 0x2de   : > { %v1229_v7 = vmax.f32 %v1175_v4, 0.0 }
 0x2df   : > { %v1368_v8 = vpop.f32.mrf.mxu0 }
 0x2e0   : > { %v1252_v9 = vpack.c.bf16 %v1229_v7, %v1228_v6  ;;  %v1369_v24 = vadd.f32 %v2947_v5, %v1368_v8 }
 0x2e2   : > { %v2950_v10 = vmax.f32 %v1369_v24, 0.0  ;;  %2342 = vmatmul.msk.bf16.gmra.mxu0 %vm602_vm2, %v1252_v9 }
 0x2e3   : > { %v1177_v11 = vpop.f32.mrf.mxu3 }
 0x2e4   : > { %1512 = vrot.lane.b32.xlu0 %v2950_v10, %s2550_s7  ;;  %v1178_v14 = vadd.f32 %v2895_v22, %v1177_v11 }
 0x2e6   : > { %v1230_v18 = vmax.f32 %v1178_v14, 0.0 }
 0x2e7   : > { %v1370_v12 = vpop.f32.mrf.mxu0 }
 0x2e8   : > { %v1371_v13 = vadd.f32 %v2947_v5, %v1370_v12 }
 0x2ea   : > { %v2957_v15 = vmax.f32 %v1371_v13, 0.0 }
 0x2eb   : > { %v1179_v16 = vpop.f32.mrf.mxu3 }
 0x2ec   : > { %v1180_v17 = vadd.f32 %v2895_v22, %v1179_v16  ;;  %1514 = vrot.lane.b32.xlu0 %v2957_v15, %s2550_s7 }
 0x2ee   : > { %v1231_v19 = vmax.f32 %v1180_v17, 0.0 }
 0x2ef   : > { %v2962_v20 = vpop.f32.mrf.mxu0 }
 0x2f0   : > { %v1253_v21 = vpack.c.bf16 %v1231_v19, %v1230_v18 }
 0x2f2   : > { %2343 = vmatmul.msk.bf16.gmra.mxu0 %vm602_vm2, %v1253_v21 }
 0x2f3   : > { %v1182_v23 = vpop.f32.mrf.mxu3 }
 0x2f4   : > { %v1183_v26 = vadd.f32 %v2895_v22, %v1182_v23 }
 0x2f6   : > { %v1232_v29 = vmax.f32 %v1183_v26, 0.0 }
 0x2f7   : > { %v2965_v25 = vpop.f32.mrf.mxu0 }
 0x2fb   : > { %v1184_v27 = vpop.f32.mrf.mxu3 }
 0x2fc   : > { %v1185_v28 = vadd.f32 %v2895_v22, %v1184_v27 }
 0x2fe   : > { %v1233_v31 = vmax.f32 %v1185_v28, 0.0 }
 0x2ff   : > { %v1378_v32 = vpop.f32.mrf.mxu0 }
 0x300   : > { %v1254_v33 = vpack.c.bf16 %v1233_v31, %v1232_v29  ;;  %v1379_v34 = vadd.f32 %v2947_v5, %v1378_v32 }
 0x302   : > { %v2970_v35 = vmax.f32 %v1379_v34, 0.0  ;;  %2344 = vmatmul.msk.bf16.gmra.mxu0 %vm602_vm2, %v1254_v33 }
 0x303   : > { %v1187_v36 = vpop.f32.mrf.mxu3 }
 0x304   : > { %1520 = vrot.lane.b32.xlu0 %v2970_v35, %s2550_s7  ;;  %v1188_v40 = vadd.f32 %v2895_v22, %v1187_v36 }
 0x306   : > { %v1234_v44 = vmax.f32 %v1188_v40, 0.0 }
 0x307   : > { %v1380_v37 = vpop.f32.mrf.mxu0 }
 0x308   : > { %v1381_v39 = vadd.f32 %v2947_v5, %v1380_v37 }
 0x30a   : > { %v2977_v41 = vmax.f32 %v1381_v39, 0.0 }
 0x30b   : > { %v1189_v42 = vpop.f32.mrf.mxu3 }
 0x30c   : > { %v1190_v43 = vadd.f32 %v2895_v22, %v1189_v42  ;;  %1650 = vrot.lane.b32.xlu2 %v2977_v41, %s2551_s8  ;;  %1522 = vrot.lane.b32.xlu0 %v2977_v41, %s2550_s7 }
 0x30e   : > { %v1235_v45 = vmax.f32 %v1190_v43, 0.0 }
 0x30f   : > { %v1383_v46 = vpop.f32.mrf.mxu0 }
 0x310   : > { %v1255_v47 = vpack.c.bf16 %v1235_v45, %v1234_v44  ;;  %v1384_v48 = vadd.f32 %v2947_v5, %v1383_v46 }
 0x312   : > { %v2985_v49 = vmax.f32 %v1384_v48, 0.0  ;;  %2345 = vmatmul.msk.bf16.gmra.mxu0 %vm602_vm2, %v1255_v47 }
 0x313   : > { %v1192_v50 = vpop.f32.mrf.mxu3 }
 0x314   : > { %1524 = vrot.lane.b32.xlu1 %v2985_v49, %s2550_s7  ;;  %1652 = vrot.lane.b32.xlu0 %v2985_v49, %s2551_s8  ;;  %v1193_v53 = vadd.f32 %v2895_v22, %v1192_v50 }
 0x316   : > { %v1236_v57 = vmax.f32 %v1193_v53, 0.0 }
 0x317   : > { %v1385_v51 = vpop.f32.mrf.mxu0 }
 0x318   : > { %v1386_v52 = vadd.f32 %v2947_v5, %v1385_v51 }
 0x31a   : > { %v2994_v54 = vmax.f32 %v1386_v52, 0.0 }
 0x31b   : > { %v1194_v55 = vpop.f32.mrf.mxu3 }
 0x31c   : > { %v1195_v56 = vadd.f32 %v2895_v22, %v1194_v55  ;;  %1654 = vrot.lane.b32.xlu1 %v2994_v54, %s2551_s8  ;;  %1526 = vrot.lane.b32.xlu2 %v2994_v54, %s2550_s7 }
 0x31e   : > { %v1237_v58 = vmax.f32 %v1195_v56, 0.0 }
 0x31f   : > { %v1388_v59 = vpop.f32.mrf.mxu0 }
 0x320   : > { %v1256_v60 = vpack.c.bf16 %v1237_v58, %v1236_v57  ;;  %v1389_v61 = vadd.f32 %v2947_v5, %v1388_v59 }
 0x322   : > { %v3002_v62 = vmax.f32 %v1389_v61, 0.0  ;;  %2346 = vmatmul.msk.bf16.gmra.mxu0 %vm602_vm2, %v1256_v60 }
 0x323   : > { %v1197_v63 = vpop.f32.mrf.mxu3 }
 0x324   : > { %1528 = vrot.lane.b32.xlu1 %v3002_v62, %s2550_s7  ;;  %1656 = vrot.lane.b32.xlu0 %v3002_v62, %s2551_s8  ;;  %v1198_v1 = vadd.f32 %v2895_v22, %v1197_v63 }
 0x326   : > { %v1238_v4 = vmax.f32 %v1198_v1, 0.0 }
 0x327   : > { %v1390_v30 = vpop.f32.mrf.mxu0 }
 0x328   : > { %v1391_v0 = vadd.f32 %v2947_v5, %v1390_v30 }
 0x32a   : > { %v3011_v2 = vmax.f32 %v1391_v0, 0.0 }
 0x32b   : > { %v1199_v3 = vpop.f32.mrf.mxu3 }
 0x32c   : > { %v1200_v38 = vadd.f32 %v2895_v22, %v1199_v3  ;;  %1658 = vrot.lane.b32.xlu2 %v3011_v2, %s2551_s8  ;;  %1530 = vrot.lane.b32.xlu0 %v3011_v2, %s2550_s7 }
 0x32e   : > { %v1239_v6 = vmax.f32 %v1200_v38, 0.0 }
 0x32f   : > { %v1393_v7 = vpop.f32.mrf.mxu0 }
 0x330   : > { %v1257_v8 = vpack.c.bf16 %v1239_v6, %v1238_v4  ;;  %v1394_v9 = vadd.f32 %v2947_v5, %v1393_v7 }
 0x332   : > { %v3019_v24 = vmax.f32 %v1394_v9, 0.0  ;;  %2347 = vmatmul.msk.bf16.gmra.mxu0 %vm602_vm2, %v1257_v8 }
 0x333   : > { %v1202_v11 = vpop.f32.mrf.mxu3 }
 0x334   : > { %1660 = vrot.lane.b32.xlu1 %v3019_v24, %s2551_s8  ;;  %1532 = vrot.lane.b32.xlu2 %v3019_v24, %s2550_s7  ;;  %v1203_v14 = vadd.f32 %v2895_v22, %v1202_v11 }
 0x336   : > { %v1240_v19 = vmax.f32 %v1203_v14, 0.0 }
 0x337   : > { %v1395_v12 = vpop.f32.mrf.mxu0 }
 0x338   : > { %v1396_v13 = vadd.f32 %v2947_v5, %v1395_v12 }
 0x33a   : > { %v3028_v16 = vmax.f32 %v1396_v13, 0.0 }
 0x33b   : > { %v1204_v17 = vpop.f32.mrf.mxu3 }
 0x33c   : > { %v1205_v18 = vadd.f32 %v2895_v22, %v1204_v17  ;;  %1534 = vrot.lane.b32.xlu1 %v3028_v16, %s2550_s7  ;;  %1662 = vrot.lane.b32.xlu0 %v3028_v16, %s2551_s8 }
 0x33e   : > { %v1241_v21 = vmax.f32 %v1205_v18, 0.0 }
 0x33f   : > { %v1398_v23 = vpop.f32.mrf.mxu0 }
 0x340   : > { %v1258_v26 = vpack.c.bf16 %v1241_v21, %v1240_v19  ;;  %v1399_v27 = vadd.f32 %v2947_v5, %v1398_v23 }
 0x342   : > { %v3036_v28 = vmax.f32 %v1399_v27, 0.0  ;;  %2348 = vmatmul.msk.bf16.gmra.mxu0 %vm602_vm2, %v1258_v26 }
 0x343   : > { %v1207_v29 = vpop.f32.mrf.mxu3 }
 0x344   : > { %1664 = vrot.lane.b32.xlu2 %v3036_v28, %s2551_s8  ;;  %1536 = vrot.lane.b32.xlu0 %v3036_v28, %s2550_s7  ;;  %v1208_v33 = vadd.f32 %v2895_v22, %v1207_v29 }
 0x346   : > { %v1242_v39 = vmax.f32 %v1208_v33, 0.0 }
 0x347   : > { %v1400_v31 = vpop.f32.mrf.mxu0 }
 0x348   : > { %v1401_v32 = vadd.f32 %v2947_v5, %v1400_v31 }
 0x34a   : > { %v3045_v34 = vmax.f32 %v1401_v32, 0.0 }
 0x34b   : > { %v1209_v36 = vpop.f32.mrf.mxu3 }
 0x34c   : > { %v1210_v37 = vadd.f32 %v2895_v22, %v1209_v36  ;;  %1666 = vrot.lane.b32.xlu1 %v3045_v34, %s2551_s8  ;;  %1538 = vrot.lane.b32.xlu2 %v3045_v34, %s2550_s7 }
 0x34e   : > { %v1243_v40 = vmax.f32 %v1210_v37, 0.0 }
 0x34f   : > { %v1403_v42 = vpop.f32.mrf.mxu0 }
 0x350   : > { %v1259_v43 = vpack.c.bf16 %v1243_v40, %v1242_v39  ;;  %v1404_v44 = vadd.f32 %v2947_v5, %v1403_v42 }
 0x352   : > { %v3053_v45 = vmax.f32 %v1404_v44, 0.0  ;;  %2349 = vmatmul.msk.bf16.gmra.mxu0 %vm602_vm2, %v1259_v43 }
 0x354   : > { %1540 = vrot.lane.b32.xlu1 %v3053_v45, %s2550_s7  ;;  %1668 = vrot.lane.b32.xlu0 %v3053_v45, %s2551_s8 }
 0x356   : > { %v3069_v50 = vpop.permute.xlu0 %1512 }
 0x357   : > { %v1405_v22 = vpop.f32.mrf.mxu0 }
 0x358   : > { %v1406_v46 = vadd.f32 %v2947_v5, %v1405_v22 }
 0x35a   : > { %v3061_v47 = vmax.f32 %v1406_v46, 0.0 }
 0x35c   : > { %1670 = vrot.lane.b32.xlu2 %v3061_v47, %s2551_s8  ;;  %1542 = vrot.lane.b32.xlu0 %v3061_v47, %s2550_s7 }
 0x35e   : > { %v3073_v52 = vpop.permute.xlu0 %1514 }
 0x35f   : > { %v3067_v48 = vpop.f32.mrf.mxu0 }
 0x366   : > { %v1651_v63 = vpop.permute.xlu2 %1650 }
 0x367   : > { %v3071_v51 = vpop.f32.mrf.mxu0 }
 0x36f   : > { %v3075_v53 = vpop.f32.mrf.mxu0 }
 0x376   : > { %v3077_v55 = vpop.permute.xlu0 %1520  ;;  %v1527_v8 = vpop.permute.xlu2 %1526 }
 0x377   : > { %v1415_v56 = vpop.f32.mrf.mxu0  ;;  %v1615_v11 = vmul.f32 %v1527_v8, %v2994_v54 }
 0x378   : > { %v1416_v57 = vadd.f32 %v2947_v5, %v1415_v56 }
 0x37a   : > { %v3080_v58 = vmax.f32 %v1416_v57, 0.0 }
 0x37c   : > { %1550 = vrot.lane.b32.xlu1 %v3080_v58, %s2550_s7  ;;  %1678 = vrot.lane.b32.xlu0 %v3080_v58, %s2551_s8 }
 0x37e   : > { %v1523_v59 = vpop.permute.xlu0 %1522 }
 0x37f   : > { %v1613_v60 = vmul.f32 %v1523_v59, %v2977_v41  ;;  %v1418_v61 = vpop.f32.mrf.mxu0 }
 0x380   : > { %v1419_v30 = vadd.f32 %v2947_v5, %v1418_v61 }
 0x381   : > { %v3088_v0 = vmul.f32 %v1651_v63, %v1613_v60 }
 0x382   : > { %v3090_v1 = vmax.f32 %v1419_v30, 0.0 }
 0x384   : > { %1680 = vrot.lane.b32.xlu1 %v3090_v1, %s2551_s8  ;;  %1552 = vrot.lane.b32.xlu2 %v3090_v1, %s2550_s7 }
 0x386   : > { %v1525_v3 = vpop.permute.xlu1 %1524  ;;  %v1653_v6 = vpop.permute.xlu0 %1652 }
 0x387   : > { %v1614_v38 = vmul.f32 %v1525_v3, %v2985_v49  ;;  %v1420_v4 = vpop.f32.mrf.mxu0  ;;  %v1659_v54 = vpop.permute.xlu2 %1658 }
 0x388   : > { %v1421_v41 = vadd.f32 %v2947_v5, %v1420_v4 }
 0x389   : > { %v3098_v7 = vmul.f32 %v1653_v6, %v1614_v38 }
 0x38a   : > { %v3100_v9 = vmax.f32 %v1421_v41, 0.0 }
 0x38c   : > { %1682 = vrot.lane.b32.xlu2 %v3100_v9, %s2551_s8  ;;  %1554 = vrot.lane.b32.xlu0 %v3100_v9, %s2550_s7 }
 0x38e   : > { %v1655_v12 = vpop.permute.xlu1 %1654 }
 0x38f   : > { %v3107_v13 = vmul.f32 %v1655_v12, %v1615_v11  ;;  %v1423_v49 = vpop.f32.mrf.mxu0  ;;  %v1533_v37 = vpop.permute.xlu2 %1532 }
 0x390   : > { %v1424_v14 = vadd.f32 %v2947_v5, %v1423_v49  ;;  %v1618_v40 = vmul.f32 %v1533_v37, %v3019_v24 }
 0x392   : > { %v3110_v17 = vmax.f32 %v1424_v14, 0.0  ;;  %v1414_v14 = vadd.f32 %v2947_v5, %v3075_v53 }
 0x394   : > { %1684 = vrot.lane.b32.xlu1 %v3110_v17, %s2551_s8  ;;  %1556 = vrot.lane.b32.xlu2 %v3110_v17, %s2550_s7 }
 0x396   : > { %v1529_v18 = vpop.permute.xlu1 %1528  ;;  %v1657_v19 = vpop.permute.xlu0 %1656 }
 0x397   : > { %v1616_v21 = vmul.f32 %v1529_v18, %v3002_v62  ;;  %v1425_v23 = vpop.f32.mrf.mxu0 }
 0x398   : > { %v1426_v26 = vadd.f32 %v2947_v5, %v1425_v23 }
 0x399   : > { %v3118_v27 = vmul.f32 %v1657_v19, %v1616_v21 }
 0x39a   : > { %v3120_v29 = vmax.f32 %v1426_v26, 0.0 }
 0x39c   : > { %1558 = vrot.lane.b32.xlu1 %v3120_v29, %s2550_s7  ;;  %1686 = vrot.lane.b32.xlu0 %v3120_v29, %s2551_s8 }
 0x39e   : > { %v1531_v31 = vpop.permute.xlu0 %1530  ;;  %v1665_v63 = vpop.permute.xlu2 %1664 }
 0x39f   : > { %v1617_v32 = vmul.f32 %v1531_v31, %v3011_v2  ;;  %v1428_v33 = vpop.f32.mrf.mxu0  ;;  %v3183_v31 = vmax.f32 %v1414_v14, 0.0 }
 0x3a0   : > { %v1429_v62 = vadd.f32 %v2947_v5, %v1428_v33 }
 0x3a1   : > { %v3128_v36 = vmul.f32 %v1659_v54, %v1617_v32 }
 0x3a2   : > { %v3130_v39 = vmax.f32 %v1429_v62, 0.0 }
 0x3a4   : > { %1688 = vrot.lane.b32.xlu2 %v3130_v39, %s2551_s8  ;;  %1560 = vrot.lane.b32.xlu0 %v3130_v39, %s2550_s7 }
 0x3a6   : > { %v1661_v42 = vpop.permute.xlu1 %1660  ;;  %v1539_v11 = vpop.permute.xlu2 %1538 }
 0x3a7   : > { %v3137_v43 = vmul.f32 %v1661_v42, %v1618_v40  ;;  %v1430_v2 = vpop.f32.mrf.mxu0 }
 0x3a8   : > { %v1431_v44 = vadd.f32 %v2947_v5, %v1430_v2 }
 0x3aa   : > { %v3140_v22 = vmax.f32 %v1431_v44, 0.0  ;;  %v1374_v44 = vadd.f32 %v2947_v5, %v2962_v20 }
 0x3ac   : > { %1690 = vrot.lane.b32.xlu1 %v3140_v22, %s2551_s8  ;;  %1562 = vrot.lane.b32.xlu2 %v3140_v22, %s2550_s7 }
 0x3ae   : > { %v3146_v46 = vpop.permute.xlu0 %1662  ;;  %v1535_v33 = vpop.permute.xlu1 %1534 }
 0x3af   : > { %v1433_v56 = vpop.f32.mrf.mxu0 }
 0x3b0   : > { %v1434_v57 = vadd.f32 %v2947_v5, %v1433_v56 }
 0x3b2   : > { %v3149_v24 = vmax.f32 %v1434_v57, 0.0  ;;  %v3217_v57 = vmax.f32 %v1374_v44, 0.0 }
 0x3b4   : > { %1564 = vrot.lane.b32.xlu1 %v3149_v24, %s2550_s7  ;;  %1692 = vrot.lane.b32.xlu0 %v3149_v24, %s2551_s8 }
 0x3b6   : > { %v1537_v59 = vpop.permute.xlu0 %1536  ;;  %v1671_v23 = vpop.permute.xlu2 %1670 }
 0x3b7   : > { %v1620_v60 = vmul.f32 %v1537_v59, %v3036_v28  ;;  %v1435_v61 = vpop.f32.mrf.mxu0  ;;  %v1409_v59 = vadd.f32 %v2947_v5, %v3067_v48 }
 0x3b8   : > { %v1436_v30 = vadd.f32 %v2947_v5, %v1435_v61 }
 0x3b9   : > { %v3157_v3 = vmul.f32 %v1665_v63, %v1620_v60 }
 0x3ba   : > { %v3159_v38 = vmax.f32 %v1436_v30, 0.0 }
 0x3bc   : > { %1694 = vrot.lane.b32.xlu2 %v3159_v38, %s2551_s8  ;;  %1566 = vrot.lane.b32.xlu0 %v3159_v38, %s2550_s7 }
 0x3be   : > { %v1667_v42 = vpop.permute.xlu1 %1666 }
 0x3bf   : > { %v1438_v4 = vpop.f32.mrf.mxu0 }
 0x3c0   : > { %v1439_v6 = vadd.f32 %v2947_v5, %v1438_v4  ;;  %v3231_v4 = vmax.f32 %v1409_v59, 0.0 }
 0x3c2   : > { %v3166_v41 = vmax.f32 %v1439_v6, 0.0 }
 0x3c4   : > { %1696 = vrot.lane.b32.xlu1 %v3166_v41, %s2551_s8  ;;  %1568 = vrot.lane.b32.xlu2 %v3166_v41, %s2550_s7 }
 0x3c6   : > { %v1669_v28 = vpop.permute.xlu0 %1668  ;;  %v1541_v56 = vpop.permute.xlu1 %1540 }
 0x3c7   : > { %v1440_v8 = vpop.f32.mrf.mxu0  ;;  %v1622_v61 = vmul.f32 %v1541_v56, %v3053_v45 }
 0x3c8   : > { %v1441_v12 = vadd.f32 %v2947_v5, %v1440_v8  ;;  %v1621_v8 = vmul.f32 %v1539_v11, %v3045_v34 }
 0x3c9   : > { %v1750_v6 = vmul.f32 %v1669_v28, %v1622_v61 }
 0x3ca   : > { %v3173_v49 = vmax.f32 %v1441_v12, 0.0  ;;  %v1749_v14 = vmul.f32 %v1667_v42, %v1621_v8 }
 0x3cc   : > { %1570 = vrot.lane.b32.xlu1 %v3173_v49, %s2550_s7  ;;  %1698 = vrot.lane.b32.xlu0 %v3173_v49, %s2551_s8 }
 0x3ce   : > { %v1543_v18 = vpop.permute.xlu0 %1542 }
 0x3cf   : > { %v1623_v19 = vmul.f32 %v1543_v18, %v3061_v47  ;;  %v1443_v21 = vpop.f32.mrf.mxu0  ;;  %v1376_v47 = vadd.f32 %v2947_v5, %v2965_v25  ;;  %v1411_v25 = vadd.f32 %v2947_v5, %v3071_v51 }
 0x3d0   : > { %v1444_v54 = vadd.f32 %v2947_v5, %v1443_v21 }
 0x3d1   : > { %v1751_v26 = vmul.f32 %v1671_v23, %v1623_v19  ;;  %v3195_v37 = vmax.f32 %v1376_v47, 0.0  ;;  %v3207_v2 = vmax.f32 %v1411_v25, 0.0 }
 0x3d2   : > { %v3185_v32 = vmax.f32 %v1444_v54, 0.0 }
 0x3d4   : > { %1572 = vrot.lane.b32.xlu2 %v3185_v32, %s2550_s7  ;;  %1676 = vrot.lane.b32.xlu0 %v3183_v31, %s2551_s8 }
 0x3d5   : > { %1832 = vrot.lane.b32.xlu1 %v1751_v26, %s2551_s8 }
 0x3d7   : > { %v1445_v53 = vpop.f32.mrf.mxu0 }
 0x3d8   : > { %v1446_v62 = vadd.f32 %v2947_v5, %v1445_v53 }
 0x3da   : > { %v3197_v40 = vmax.f32 %v1446_v62, 0.0 }
 0x3dc   : > { %1700 = vrot.lane.b32.xlu2 %v3185_v32, %s2551_s8  ;;  %1518 = vrot.lane.b32.xlu0 %v3195_v37, %s2550_s7 }
 0x3dd   : > { %1574 = vrot.lane.b32.xlu1 %v3197_v40, %s2550_s7 }
 0x3de   : > { %v1553_v51 = vpop.permute.xlu2 %1552 }
 0x3df   : > { %v1628_v61 = vmul.f32 %v1553_v51, %v3090_v1 }
 0x3e4   : > { %1648 = vrot.lane.b32.xlu2 %v2970_v35, %s2551_s8  ;;  %1674 = vrot.lane.b32.xlu0 %v3207_v2, %s2551_s8 }
 0x3e5   : > { %1702 = vrot.lane.b32.xlu1 %v3197_v40, %s2551_s8 }
 0x3e6   : > { %v1683_v5 = vpop.permute.xlu2 %1682 }
 0x3ec   : > { %1646 = vrot.lane.b32.xlu2 %v3195_v37, %s2551_s8  ;;  %1516 = vrot.lane.b32.xlu0 %v3217_v57, %s2550_s7 }
 0x3ed   : > { %1548 = vrot.lane.b32.xlu1 %v3183_v31, %s2550_s7 }
 0x3ee   : > { %v1551_v60 = vpop.permute.xlu1 %1550  ;;  %v1679_v63 = vpop.permute.xlu0 %1678 }
 0x3ef   : > { %v1627_v20 = vmul.f32 %v1551_v60, %v3080_v58  ;;  %v1557_v12 = vpop.permute.xlu2 %1556 }
 0x3f0   : > { %v1630_v18 = vmul.f32 %v1557_v12, %v3110_v17 }
 0x3f1   : > { %v3229_v30 = vmul.f32 %v1679_v63, %v1627_v20 }
 0x3f4   : > { %1644 = vrot.lane.b32.xlu2 %v3217_v57, %s2551_s8  ;;  %1672 = vrot.lane.b32.xlu0 %v3231_v4, %s2551_s8 }
 0x3f5   : > { %1830 = vrot.lane.b32.xlu1 %v1750_v6, %s2551_s8 }
 0x3f6   : > { %v1681_v45 = vpop.permute.xlu1 %1680 }
 0x3f7   : > { %v1756_v63 = vmul.f32 %v1681_v45, %v1628_v61 }
 0x3fd   : > { %1546 = vrot.lane.b32.xlu1 %v3207_v2, %s2550_s7 }
 0x3fe   : > { %v1555_v48 = vpop.permute.xlu0 %1554  ;;  %v1689_v23 = vpop.permute.xlu2 %1688 }
 0x3ff   : > { %v1629_v58 = vmul.f32 %v1555_v48, %v3100_v9  ;;  %v1619_v9 = vmul.f32 %v1535_v33, %v3028_v16 }
 0x401   : > { %v3242_v28 = vmul.f32 %v1683_v5, %v1629_v58  ;;  %v1747_v11 = vmul.f32 %v3146_v46, %v1619_v9 }
 0x405   : > { %1828 = vrot.lane.b32.xlu1 %v1749_v14, %s2551_s8 }
 0x406   : > { %v1685_v19 = vpop.permute.xlu1 %1684  ;;  %v1563_v54 = vpop.permute.xlu2 %1562 }
 0x407   : > { %v3246_v21 = vmul.f32 %v1685_v19, %v1630_v18 }
 0x40d   : > { %1544 = vrot.lane.b32.xlu1 %v3231_v4, %s2550_s7 }
 0x40e   : > { %v1687_v26 = vpop.permute.xlu0 %1686  ;;  %v1559_v34 = vpop.permute.xlu1 %1558 }
 0x40f   : > { %v1631_v44 = vmul.f32 %v1559_v34, %v3120_v29 }
 0x411   : > { %v1759_v59 = vmul.f32 %v1687_v26, %v1631_v44 }
 0x415   : > { %1826 = vrot.lane.b32.xlu1 %v3157_v3, %s2551_s8 }
 0x416   : > { %v1695_v17 = vpop.permute.xlu2 %1694  ;;  %v1561_v47 = vpop.permute.xlu0 %1560 }
 0x41d   : > { %1824 = vrot.lane.b32.xlu1 %v1747_v11, %s2551_s8 }
 0x41e   : > { %v1691_v53 = vpop.permute.xlu1 %1690  ;;  %v1569_v62 = vpop.permute.xlu2 %1568 }
 0x425   : > { %1822 = vrot.lane.b32.xlu1 %v3137_v43, %s2551_s8 }
 0x426   : > { %v1565_v42 = vpop.permute.xlu1 %1564  ;;  %v1693_v25 = vpop.permute.xlu0 %1692 }
 0x427   : > { %v1634_v3 = vmul.f32 %v1565_v42, %v3149_v24  ;;  %v1636_v24 = vmul.f32 %v1569_v62, %v3166_v41 }
 0x429   : > { %v1762_v56 = vmul.f32 %v1693_v25, %v1634_v3 }
 0x42b   : > { %1854 = vrot.lane.b32.xlu2 %v1762_v56, %s2551_s8 }
 0x42d   : > { %1848 = vrot.lane.b32.xlu1 %v1759_v59, %s2551_s8 }
 0x42e   : > { %v1573_v16 = vpop.permute.xlu2 %1572  ;;  %v1567_v46 = vpop.permute.xlu0 %1566 }
 0x42f   : > { %v1635_v33 = vmul.f32 %v1567_v46, %v3159_v38  ;;  %v1638_v1 = vmul.f32 %v1573_v16, %v3185_v32 }
 0x431   : > { %v1763_v60 = vmul.f32 %v1695_v17, %v1635_v33 }
 0x433   : > { %1856 = vrot.lane.b32.xlu2 %v1763_v60, %s2551_s8 }
 0x435   : > { %1816 = vrot.lane.b32.xlu1 %v3107_v13, %s2551_s8  ;;  %v1612_v13 = vmul.f32 %v3077_v55, %v2970_v35  ;;  %v1632_v35 = vmul.f32 %v1561_v47, %v3130_v39 }
 0x436   : > { %v1697_v43 = vpop.permute.xlu1 %1696  ;;  %v1701_v29 = vpop.permute.xlu2 %1700 }
 0x437   : > { %v1764_v20 = vmul.f32 %v1697_v43, %v1636_v24  ;;  %v1766_v51 = vmul.f32 %v1701_v29, %v1638_v1  ;;  %v1760_v19 = vmul.f32 %v1689_v23, %v1632_v35  ;;  %v1608_v43 = vmul.f32 %v3069_v50, %v2950_v10 }
 0x43b   : > { %1858 = vrot.lane.b32.xlu2 %v1764_v20, %s2551_s8 }
 0x43d   : > { %1842 = vrot.lane.b32.xlu1 %v1756_v63, %s2551_s8 }
 0x43e   : > { %v1571_v6 = vpop.permute.xlu1 %1570  ;;  %v1649_v5 = vpop.permute.xlu2 %1648 }
 0x43f   : > { %v1637_v38 = vmul.f32 %v1571_v6, %v3173_v49  ;;  %v1699_v48 = vpop.permute.xlu0 %1698  ;;  %v1740_v8 = vmul.f32 %v1649_v5, %v1612_v13  ;;  %v1633_v49 = vmul.f32 %v1563_v54, %v3140_v22 }
 0x441   : > { %v1765_v58 = vmul.f32 %v1699_v48, %v1637_v38  ;;  %v1761_v12 = vmul.f32 %v1691_v53, %v1633_v49 }
 0x443   : > { %1860 = vrot.lane.b32.xlu2 %v1765_v58, %s2551_s8 }
 0x445   : > { %1810 = vrot.lane.b32.xlu1 %v1740_v8, %s2551_s8 }
 0x446   : > { %v1647_v9 = vpop.permute.xlu2 %1646 }
 0x447   : > { %v1833_v41 = vpop.permute.xlu1 %1832  ;;  %v1677_v32 = vpop.permute.xlu0 %1676 }
 0x448   : > { %2350 = vmatpush.xpose.msk.msra.mxu1 %vm1866_vm3, %v1833_v41 }
 0x44b   : > { %1862 = vrot.lane.b32.xlu2 %v1766_v51, %s2551_s8  ;;  %v2552_v51 = vmov 1.0  }
 0x44e   : > { %v1645_v47 = vpop.permute.xlu2 %1644 }
 0x44f   : > { %v1575_v45 = vpop.permute.xlu1 %1574  ;;  %v1519_v22 = vpop.permute.xlu0 %1518 }
 0x450   : > { %v1639_v55 = vmul.f32 %v1575_v45, %v3197_v40 }
 0x453   : > { %1852 = vrot.lane.b32.xlu2 %v1761_v12, %s2551_s8  ;;  %v1769_v12 = vstv %s1768_s9 }
 0x457   : > { %v1703_v14 = vpop.permute.xlu1 %1702  ;;  %v1675_v40 = vpop.permute.xlu0 %1674 }
 0x458   : > { %v1767_v18 = vmul.f32 %v1703_v14, %v1639_v55  ;;  %v1979_v14 = vlaneseq }
 0x45a   : > { %1864 = vrot.lane.b32.xlu0 %v1767_v18, %s2551_s8  ;;  %vm1981_vm4 = vcmp.lt.s32.totalorder %v1979_v14, 256 }
 0x45b   : > { %1850 = vrot.lane.b32.xlu2 %v1760_v19, %s2551_s8 }
 0x45f   : > { %v1549_v26 = vpop.permute.xlu1 %1548  ;;  %v1517_v17 = vpop.permute.xlu0 %1516 }
 0x462   : > { %1642 = vrot.lane.b32.xlu0 %v2957_v15, %s2551_s8 }
 0x463   : > { %1818 = vrot.lane.b32.xlu2 %v3118_v27, %s2551_s8  ;;  %v1626_v27 = vmul.f32 %v1549_v26, %v3183_v31 }
 0x467   : > { %v1831_v54 = vpop.permute.xlu1 %1830  ;;  %v1673_v42 = vpop.permute.xlu0 %1672 }
 0x468   : > { %2351 = vmatpush.xpose.msk.msra.mxu1 %vm1866_vm3, %v1831_v54 }
 0x46a   : > { %1640 = vrot.lane.b32.xlu0 %v2950_v10, %s2551_s8 }
 0x46b   : > { %1844 = vrot.lane.b32.xlu2 %v3242_v28, %s2551_s8  ;;  %v1754_v28 = vmul.f32 %v1677_v32, %v1626_v27 }
 0x46f   : > { %v1547_v39 = vpop.permute.xlu1 %1546 }
 0x470   : > { %v1625_v23 = vmul.f32 %v1547_v39, %v3207_v2 }
 0x472   : > { %v1753_v34 = vmul.f32 %v1675_v40, %v1625_v23  ;;  %1820 = vrot.lane.b32.xlu0 %v3128_v36, %s2551_s8  ;;  %v1610_v36 = vmul.f32 %v1517_v17, %v3217_v57 }
 0x473   : > { %1812 = vrot.lane.b32.xlu2 %v3088_v0, %s2551_s8 }
 0x474   : > { %1836 = vrot.lane.b32.xlu1 %v1753_v34, %s2551_s8  ;;  %v1738_v0 = vmul.f32 %v1645_v47, %v1610_v36 }
 0x477   : > { %v1829_v11 = vpop.permute.xlu1 %1828 }
 0x478   : > { %2352 = vmatpush.xpose.msk.msra.mxu1 %vm1866_vm3, %v1829_v11 }
 0x47a   : > { %1846 = vrot.lane.b32.xlu0 %v3246_v21, %s2551_s8  ;;  %v1611_v21 = vmul.f32 %v1519_v22, %v3195_v37 }
 0x47b   : > { %1838 = vrot.lane.b32.xlu2 %v1754_v28, %s2551_s8 }
 0x47c   : > { %v1739_v62 = vmul.f32 %v1647_v9, %v1611_v21 }
 0x47f   : > { %v1545_v2 = vpop.permute.xlu1 %1544 }
 0x480   : > { %v1624_v57 = vmul.f32 %v1545_v2, %v3231_v4  ;;  %v1609_v4 = vmul.f32 %v3073_v52, %v2957_v15 }
 0x482   : > { %1814 = vrot.lane.b32.xlu0 %v3098_v7, %s2551_s8  ;;  %v1752_v25 = vmul.f32 %v1673_v42, %v1624_v57 }
 0x483   : > { %1806 = vrot.lane.b32.xlu2 %v1738_v0, %s2551_s8 }
 0x485   : > { %v1855_v44 = vpop.permute.xlu2 %1854 }
 0x487   : > { %v1827_v31 = vpop.permute.xlu1 %1826 }
 0x488   : > { %2353 = vmatpush.xpose.msk.msra.mxu1 %vm1866_vm3, %v1827_v31 }
 0x48a   : > { %1840 = vrot.lane.b32.xlu0 %v3229_v30, %s2551_s8 }
 0x48d   : > { %v1857_v3 = vpop.permute.xlu2 %1856 }
 0x48f   : > { %v1825_v53 = vpop.permute.xlu1 %1824 }
 0x490   : > { %2354 = vmatpush.xpose.msk.msra.mxu1 %vm1866_vm3, %v1825_v53 }
 0x492   : > { %1808 = vrot.lane.b32.xlu0 %v1739_v62, %s2551_s8 }
 0x495   : > { %v1859_v30 = vpop.permute.xlu2 %1858 }
 0x497   : > { %v1823_v7 = vpop.permute.xlu1 %1822 }
 0x498   : > { %2355 = vmatpush.xpose.msk.msra.mxu1 %vm1866_vm3, %v1823_v7 }
 0x49a   : > { %1834 = vrot.lane.b32.xlu0 %v1752_v25, %s2551_s8 }
 0x49d   : > { %v1861_v56 = vpop.permute.xlu2 %1860 }
 0x49f   : > { %v1849_v61 = vpop.permute.xlu1 %1848 }
 0x4a5   : > { %v1863_v37 = vpop.permute.xlu2 %1862 }
 0x4a7   : > { %v1817_v20 = vpop.permute.xlu1 %1816 }
 0x4ad   : > { %v1853_v59 = vpop.permute.xlu2 %1852 }
 0x4af   : > { %v1843_v63 = vpop.permute.xlu1 %1842 }
 0x4b5   : > { %v1851_v60 = vpop.permute.xlu2 %1850 }
 0x4b7   : > { %v1811_v5 = vpop.permute.xlu1 %1810 }
 0x4bd   : > { %v1819_v15 = vpop.permute.xlu2 %1818 }
 0x4c5   : > { %v1845_v10 = vpop.permute.xlu2 %1844 }
 0x4cc   : > { %v1865_v16 = vpop.permute.xlu0 %1864 }
 0x4cd   : > { %2367 = vmatpush.xpose.msk.msra.mxu2 %vm1866_vm3, %v1865_v16  ;;  %v1813_v6 = vpop.permute.xlu2 %1812 }
 0x4d1   : > { %2368 = vmatpush.xpose.msk.msra.mxu2 %vm1866_vm3, %v1863_v37 }
 0x4d4   : > { %v1643_v46 = vpop.permute.xlu0 %1642 }
 0x4d5   : > { %v1737_v33 = vmul.f32 %v1643_v46, %v1609_v4  ;;  %2369 = vmatpush.xpose.msk.msra.mxu2 %vm1866_vm3, %v1861_v56  ;;  %v1839_v13 = vpop.permute.xlu2 %1838 }
 0x4d7   : > { %1804 = vrot.lane.b32.xlu1 %v1737_v33, %s2551_s8 }
 0x4d9   : > { %2370 = vmatpush.xpose.msk.msra.mxu2 %vm1866_vm3, %v1859_v30 }
 0x4dc   : > { %v1641_v29 = vpop.permute.xlu0 %1640 }
 0x4dd   : > { %v1736_v24 = vmul.f32 %v1641_v29, %v1608_v43  ;;  %2371 = vmatpush.xpose.msk.msra.mxu2 %vm1866_vm3, %v1857_v3  ;;  %v1807_v1 = vpop.permute.xlu2 %1806 }
 0x4df   : > { %1802 = vrot.lane.b32.xlu2 %v1736_v24, %s2551_s8 }
 0x4e1   : > { %2372 = vmatpush.xpose.msk.msra.mxu2 %vm1866_vm3, %v1855_v44 }
 0x4e4   : > { %v1821_v52 = vpop.permute.xlu0 %1820 }
 0x4e5   : > { %2356 = vmatpush.xpose.msk.msra.mxu1 %vm1866_vm3, %v1821_v52  ;;  %2373 = vmatpush.xpose.msk.msra.mxu2 %vm1866_vm3, %v1853_v59 }
 0x4e6   : > { %v1837_v58 = vpop.permute.xlu1 %1836 }
 0x4e9   : > { %2357 = vmatpush.xpose.msk.msra.mxu1 %vm1866_vm3, %v1819_v15  ;;  %2374 = vmatpush.xpose.msk.msra.mxu2 %vm1866_vm3, %v1851_v60 }
 0x4ec   : > { %v1847_v50 = vpop.permute.xlu0 %1846 }
 0x4ed   : > { %2358 = vmatpush.xpose.msk.msra.mxu1 %vm1866_vm3, %v1817_v20  ;;  %2375 = vmatpush.xpose.msk.msra.mxu2 %vm1866_vm3, %v1849_v61 }
 0x4f1   : > { %2376 = vmatpush.xpose.msk.msra.mxu2 %vm1866_vm3, %v1847_v50 }
 0x4f4   : > { %v1815_v38 = vpop.permute.xlu0 %1814 }
 0x4f5   : > { %2359 = vmatpush.xpose.msk.msra.mxu1 %vm1866_vm3, %v1815_v38  ;;  %2377 = vmatpush.xpose.msk.msra.mxu2 %vm1866_vm3, %v1845_v10 }
 0x4f9   : > { %2360 = vmatpush.xpose.msk.msra.mxu1 %vm1866_vm3, %v1813_v6  ;;  %2378 = vmatpush.xpose.msk.msra.mxu2 %vm1866_vm3, %v1843_v63 }
 0x4fc   : > { %v1841_v48 = vpop.permute.xlu0 %1840 }
 0x4fd   : > { %2361 = vmatpush.xpose.msk.msra.mxu1 %vm1866_vm3, %v1811_v5  ;;  %2379 = vmatpush.xpose.msk.msra.mxu2 %vm1866_vm3, %v1841_v48 }
 0x501   : > { %2380 = vmatpush.xpose.msk.msra.mxu2 %vm1866_vm3, %v1839_v13 }
 0x504   : > { %v1809_v8 = vpop.permute.xlu0 %1808 }
 0x505   : > { %2362 = vmatpush.xpose.msk.msra.mxu1 %vm1866_vm3, %v1809_v8  ;;  %2381 = vmatpush.xpose.msk.msra.mxu2 %vm1866_vm3, %v1837_v58 }
 0x509   : > { %2363 = vmatpush.xpose.msk.msra.mxu1 %vm1866_vm3, %v1807_v1 }
 0x50c   : > { %v1835_v41 = vpop.permute.xlu0 %1834 }
 0x50d   : > { %2382 = vmatpush.xpose.msk.msra.mxu2 %vm1866_vm3, %v1835_v41 }
 0x510   : > { %2383 = vmatmul.msk.f32.vlgmr.msra.gmra.mxu2 %vm1866_vm3, %v2552_v51 }
 0x539   : > { %v1803_v45 = vpop.permute.xlu2 %1802 }
 0x549   : > { %v1805_v49 = vpop.permute.xlu1 %1804 }
 0x54a   : > { %2364 = vmatpush.xpose.msk.msra.mxu1 %vm1866_vm3, %v1805_v49 }
 0x54e   : > { %2365 = vmatpush.xpose.msk.msra.mxu1 %vm1866_vm3, %v1803_v45 }
 0x551   : > { %2366 = vmatmul.msk.f32.vlgmr.msra.gmra.mxu1 %vm1866_vm3, %v2552_v51 }
 0x593   : > { %v1971_v35 = vpop.f32.mrf.mxu2 }
 0x594   : > { %v1972_v55 = vadd.f32 %v1971_v35, %v1769_v12 }
 0x596   : > { %v1976_v18 = vrot.slane %v1972_v55, 7 }
 0x5ce   : > { %v1951_v19 = vpop.f32.mrf.mxu1 }
 0x5cf   : > { %v1952_v32 = vadd.f32 %v1951_v19, %v1769_v12 }
 0x5d1   : > { %v1977_v26 = vsel %vm411_vm0, %v1952_v32, %v1976_v18 }
 0x5d2   : > { %1983 = vst.msk [vmem:[%s219_s16] sm:$0x3] %vm1981_vm4, %v1977_v26 }
 0x5d3   : > { %2513 = shalt.err (!%p2510_p3)
}
 0x5d4   : > { %2439 = dma.vmem_to_hbm [thread:$0]  (%p2624_p5), %s1998_s17, 32, %s2000_s18, %s1985_s4  }
 0x5d5 PF: > { %p2445_p4 = scmp.ge.s32.totalorder %s2548_s23, 2  ;;  %s2011_s9 = sand.u32 1, %s2536_s20  }
 0x5d6   : > { %s2012_s10 = scalar_lea.sflag [#allocation4], %s2011_s9 }
 0x5d7   : > { %p2442_p7 = pnand %p2445_p4, %p2628_p6 }
 0x5d9   : > { %p2443_p8 = pneg %p2442_p7 }
 0x5db   : > { %2531 = dma.done.wait (%p2443_p8), %s2012_s10, 32  }
 0x5dc   : > { %2533 = vsyncadd (%p2443_p8), %s2012_s10, 4294967264  ;;  %p16_p9 = scmp.ge.s32.totalorder %s2611_s25, 4   ;;  %s3391_s20 = smov %s2540_s21 }
 0x5dd   : > { %s3392_s21 = smov %s2544_s22  ;;  %s3393_s22 = smov %s2622_s28 }
 0x5de   : > { %s3394_s23 = smov %s2611_s25  ;;  %18 = sbr.rel (!%p16_p9) target bundleno = 5 (0x5), region = 78 }
 0x5e3   :  { %2018 = vsyncpa [#allocation4], 1 }
 0x5e4   :  { %2020 = vsyncpa [#allocation4 + $0x1], 1 }

</bundles_post_ra>
